<compile_context>
chip_gen: v7x
topology: tpu7x:2x2x1
jax: 0.10.0
libtpu: 0.0.40
codegen_flags: <defaults>
</compile_context>

<pallas_src>
import functools

import jax
import jax.numpy as jnp
from jax.experimental import pallas as pl
from jax.experimental.pallas import tpu as pltpu


# ----------------------------------------------------------------------------
# helpers
# ----------------------------------------------------------------------------
def _round_up(x, m):
    return ((x + m - 1) // m) * m


def _cdiv(a, b):
    return (a + b - 1) // b


def _vmem_capacity_bytes():
    """Physical VMEM of the local TPU generation (conservative fallbacks)."""
    try:
        info = pltpu.get_tpu_info()
        for attr in ("vmem_capacity_bytes", "vmem_size_bytes", "vmem_bytes"):
            v = getattr(info, attr, None)
            if v:
                return int(v)
    except Exception:
        pass
    try:
        kind = jax.devices()[0].device_kind.lower()
        if "7" in kind:           # v7x: 64 MiB per TensorCore
            return 64 << 20
        return 128 << 20          # v4/v5e/v6e: 128 MiB
    except Exception:
        return 64 << 20           # conservative default


def _padded_vmem_bytes(shape, dtype):
    """VMEM footprint of a 2-D array after (sublane, 128-lane) padding."""
    rows, d = shape
    esize = jnp.dtype(dtype).itemsize
    sublane = 8 * max(1, 4 // esize)        # 8 (f32) / 16 (bf16) / 32 (i8)
    return _round_up(rows, sublane) * _round_up(d, 128) * esize


def _poincare_score(u, v, beta, c, g):
    """Poincare distance + linear head. Returns a lane-dense (g, 128) block."""
    d = u.shape[-1]
    # Leading-axis-only split: (g*128, d) -> (g, 128, d) is a free relayout;
    # the reductions below then land directly in a lane-dense (g, 128) shape.
    u = u.reshape(g, 128, d)
    v = v.reshape(g, 128, d)
    diff = u - v
    sq_dist = jnp.sum(diff * diff, axis=-1)                 # (g, 128)
    sq_u = jnp.sum(u * u, axis=-1)
    sq_v = jnp.sum(v * v, axis=-1)
    eps = 1e-7
    denom = jnp.maximum(1.0 - sq_u, eps) * jnp.maximum(1.0 - sq_v, eps)
    t = 2.0 * sq_dist / denom                               # arcosh arg = 1+t
    # arcosh(1 + t) = log1p(t + sqrt(t*(t+2))): cancellation-free, and log1p
    # keeps relative precision when u ~= v (t -> 0).
    dist = jnp.log1p(t + jnp.sqrt(t * (t + 2.0)))
    return beta * dist + c


# ----------------------------------------------------------------------------
# Kernel 1: table-resident fast path (tables live in VMEM, gather = vld/vst)
# ----------------------------------------------------------------------------
def _poincare_resident_kernel(uid_ref, iid_ref,          # ids (SMEM, prefetch)
                              user_vmem, item_vmem,      # resident tables (VMEM)
                              beta_ref, c_ref,           # (1,) f32 (SMEM)
                              out_ref,                   # (g, 128) f32 (VMEM)
                              u_buf, v_buf,              # (tb, D) gather scratch
                              *, tb, g):
    base = pl.program_id(0) * tb

    # In-VMEM gather: each row is a plain vector load + store (no per-row HBM
    # DMA descriptors).  4-way manual unroll amortizes scalar loop overhead
    # and lets the scalar slots co-issue the SMEM id reads.
    @pl.loop(0, tb // 4)
    def _gather(k):
        r = pl.multiple_of(k * 4, 4)
        for s in range(4):
            row = base + r + s
            uid = uid_ref[row]
            iid = iid_ref[row]
            u_buf[pl.ds(r + s, 1), :] = user_vmem[pl.ds(uid, 1), :]
            v_buf[pl.ds(r + s, 1), :] = item_vmem[pl.ds(iid, 1), :]

    u = u_buf[...].astype(jnp.float32)
    v = v_buf[...].astype(jnp.float32)
    out_ref[...] = _poincare_score(u, v, beta_ref[0], c_ref[0], g)


# ----------------------------------------------------------------------------
# Kernel 2: HBM gather fallback (huge tables) — double-buffered per-row DMAs,
# aggregate waits, unrolled issue loop, statically-guarded pad tail.
# ----------------------------------------------------------------------------
def _poincare_hbm_kernel(uid_ref, iid_ref,               # ids (SMEM, prefetch)
                         user_hbm, item_hbm,             # tables (HBM, pl.ANY)
                         beta_ref, c_ref,                # (1,) f32 (SMEM)
                         out_ref,                        # (g, 128) f32 (VMEM)
                         u_buf, v_buf, sem,              # (2,tb,D)x2 + (2,2) sems
                         *, tb, g, tpc, num_tiles, rows_last):
    core = pl.program_id(0)          # 'parallel' axis (megacore split on v7x)
    j = pl.program_id(1)             # sequential tile index within this core
    tile = core * tpc + j

    def _issue(t, slot, n_rows):
        """Issue per-row gather DMAs for tile `t` into buffer slot `slot`."""
        base = t * tb
        n4 = (n_rows // 4) * 4
        if n4:
            @pl.loop(0, n4 // 4)
            def _(k):
                r = pl.multiple_of(k * 4, 4)
                for s in range(4):
                    row = base + r + s
                    uid = uid_ref[row]
                    iid = iid_ref[row]
                    pltpu.make_async_copy(
                        user_hbm.at[pl.ds(uid, 1)],
                        u_buf.at[slot, pl.ds(r + s, 1)],
                        sem.at[0, slot]).start()
                    pltpu.make_async_copy(
                        item_hbm.at[pl.ds(iid, 1)],
                        v_buf.at[slot, pl.ds(r + s, 1)],
                        sem.at[1, slot]).start()
        for s in range(n4, n_rows):                      # static tail (<4 rows)
            uid = uid_ref[base + s]
            iid = iid_ref[base + s]
            pltpu.make_async_copy(user_hbm.at[pl.ds(uid, 1)],
                                  u_buf.at[slot, pl.ds(s, 1)],
                                  sem.at[0, slot]).start()
            pltpu.make_async_copy(item_hbm.at[pl.ds(iid, 1)],
                                  v_buf.at[slot, pl.ds(s, 1)],
                                  sem.at[1, slot]).start()

    def _wait(slot, n_rows):
        # Aggregate wait: one wait per semaphore with a descriptor whose byte
        # count equals the sum of the n_rows row copies (replaces O(tb)
        # per-row waits that serialized the scalar unit / broke sst->sld
        # forwarding).  Same pattern as the official paged-attention kernel.
        pltpu.make_async_copy(u_buf.at[slot, pl.ds(0, n_rows)],
                              u_buf.at[slot, pl.ds(0, n_rows)],
                              sem.at[0, slot]).wait()
        pltpu.make_async_copy(v_buf.at[slot, pl.ds(0, n_rows)],
                              v_buf.at[slot, pl.ds(0, n_rows)],
                              sem.at[1, slot]).wait()

    def _rows_branch(t, body):
        # The globally-last tile may be partial (static row count rows_last);
        # guard so the pad tail neither issues nor waits on garbage gathers.
        if rows_last == tb:
            body(tb)
        else:
            is_last = t == num_tiles - 1

            @pl.when(is_last)
            def _():
                body(rows_last)

            @pl.when(jnp.logical_not(is_last))
            def _():
                body(tb)

    slot = j % 2

    # Prime this core's pipeline at its first local step.
    @pl.when(j == 0)
    def _():
        _rows_branch(tile, lambda n: _issue(tile, 0, n))

    # Cross-tile double buffering: issue the NEXT tile's gather before waiting
    # on the current one, so descriptor issue overlaps the in-flight transfer.
    if tpc > 1:
        @pl.when(j + 1 < tpc)
        def _():
            nxt = tile + 1
            nxt_slot = (j + 1) % 2
            _rows_branch(nxt, lambda n: _issue(nxt, nxt_slot, n))

    _rows_branch(tile, lambda n: _wait(slot, n))

    u = u_buf[slot].astype(jnp.float32)
    v = v_buf[slot].astype(jnp.float32)
    out_ref[...] = _poincare_score(u, v, beta_ref[0], c_ref[0], g)


# ----------------------------------------------------------------------------
# Wrapper
# ----------------------------------------------------------------------------
def _forward_chunk(user_emb, item_emb, beta_s, c_s, uid, iid, block_b, force_hbm):
    batch = uid.shape[0]
    emb_dim = user_emb.shape[-1]

    # --- tile size: multiple of 128; >=2 tiles when the batch allows so the
    #     'parallel' axis can feed both TensorCores on v7x.
    block_b = max(128, _round_up(block_b, 128))
    tb = min(block_b, _round_up(batch, 128))
    if _round_up(batch, 128) >= 256:
        tb = min(tb, _round_up(_cdiv(batch, 2), 128))
    tb = max(tb, 128)
    bp = _round_up(batch, tb)
    num_tiles = bp // tb
    g = tb // 128
    pad = bp - batch

    if pad:
        uid = jnp.concatenate([uid, jnp.zeros((pad,), jnp.int32)])
        iid = jnp.concatenate([iid, jnp.zeros((pad,), jnp.int32)])

    out_shape = jax.ShapeDtypeStruct((num_tiles, g, 128), jnp.float32)

    # --- per-generation VMEM budget & resident-table decision ----------------
    cap = _vmem_capacity_bytes()
    resident_limit = (48 << 20) if cap <= (64 << 20) else (100 << 20)
    tables_bytes = (_padded_vmem_bytes(user_emb.shape, user_emb.dtype)
                    + _padded_vmem_bytes(item_emb.shape, item_emb.dtype))
    buf_bytes = 2 * _padded_vmem_bytes((tb, emb_dim), user_emb.dtype)
    reserve = (8 << 20) + buf_bytes
    # 2x: Pallas may double-buffer the (constant-index) table input blocks.
    resident = (not force_hbm) and (2 * tables_bytes <= max(resident_limit - reserve, 1))

    if resident:
        kernel = functools.partial(_poincare_resident_kernel, tb=tb, g=g)
        grid_spec = pltpu.PrefetchScalarGridSpec(
            num_scalar_prefetch=2,                          # uid, iid -> SMEM
            grid=(num_tiles,),
            in_specs=[
                # Full-table, constant-index VMEM blocks: DMA'd once per core,
                # then every gather is an on-chip vector load.
                pl.BlockSpec(user_emb.shape, lambda i, u_, i_: (0, 0)),
                pl.BlockSpec(item_emb.shape, lambda i, u_, i_: (0, 0)),
                pl.BlockSpec(memory_space=pltpu.MemorySpace.SMEM),   # beta
                pl.BlockSpec(memory_space=pltpu.MemorySpace.SMEM),   # c
            ],
            out_specs=pl.BlockSpec((None, g, 128), lambda i, u_, i_: (i, 0, 0)),
            scratch_shapes=[
                pltpu.VMEM((tb, emb_dim), user_emb.dtype),
                pltpu.VMEM((tb, emb_dim), item_emb.dtype),
            ],
        )
        dims = ("parallel",)
        vmem_limit = resident_limit
    else:
        # Split the tile axis over a leading 'parallel' axis (2-way when the
        # tile count is even) so v7x can still use both TensorCores while the
        # inner 'arbitrary' axis carries the cross-tile double buffering.
        ncs = 2 if (num_tiles >= 2 and num_tiles % 2 == 0) else 1
        tpc = num_tiles // ncs
        rows_last = tb - pad
        kernel = functools.partial(_poincare_hbm_kernel, tb=tb, g=g, tpc=tpc,
                                   num_tiles=num_tiles, rows_last=rows_last)
        grid_spec = pltpu.PrefetchScalarGridSpec(
            num_scalar_prefetch=2,                          # uid, iid -> SMEM
            grid=(ncs, tpc),
            in_specs=[
                pl.BlockSpec(memory_space=pl.ANY),                   # user tbl (HBM)
                pl.BlockSpec(memory_space=pl.ANY),                   # item tbl (HBM)
                pl.BlockSpec(memory_space=pltpu.MemorySpace.SMEM),   # beta
                pl.BlockSpec(memory_space=pltpu.MemorySpace.SMEM),   # c
            ],
            out_specs=pl.BlockSpec(
                (None, g, 128), lambda ci, ji, u_, i_: (ci * tpc + ji, 0, 0)),
            scratch_shapes=[
                pltpu.VMEM((2, tb, emb_dim), user_emb.dtype),   # double buffers
                pltpu.VMEM((2, tb, emb_dim), item_emb.dtype),
                pltpu.SemaphoreType.DMA((2, 2)),                # [table, slot]
            ],
        )
        dims = ("parallel", "arbitrary")
        vmem_limit = 32 << 20

    out = pl.pallas_call(
        kernel,
        out_shape=out_shape,
        grid_spec=grid_spec,
        compiler_params=pltpu.CompilerParams(
            dimension_semantics=dims,
            vmem_limit_bytes=vmem_limit,
        ),
    )(uid, iid, user_emb, item_emb, beta_s, c_s)

    return out.reshape(-1)[:batch]                        # score.view(-1)


@functools.partial(jax.jit, static_argnames=("block_b", "force_hbm"))
def hyperbolic_embedding_forward(user_emb, item_emb, beta, c,
                                 user_ids, item_ids, *,
                                 block_b=512, force_hbm=False):
    """Fused gather + Poincare scoring (matching_layer='linear'). Returns (B,)."""
    uid = user_ids.reshape(-1).astype(jnp.int32)
    iid = item_ids.reshape(-1).astype(jnp.int32)
    batch = uid.shape[0]
    beta_s = beta.reshape(-1).astype(jnp.float32)
    c_s = c.reshape(-1).astype(jnp.float32)

    # The ids are scalar-prefetched into SMEM; 1-D SMEM pads to next_pow2(4N)
    # bytes, so chunk huge batches across pallas_calls to bound SMEM usage.
    max_rows = 32768
    if batch > max_rows:
        parts = []
        for s in range(0, batch, max_rows):
            parts.append(_forward_chunk(user_emb, item_emb, beta_s, c_s,
                                        uid[s:s + max_rows], iid[s:s + max_rows],
                                        block_b, force_hbm))
        return jnp.concatenate(parts, axis=0)
    return _forward_chunk(user_emb, item_emb, beta_s, c_s, uid, iid,
                          block_b, force_hbm)


# ----------------------------------------------------------------------------
# Pure-JAX reference
# ----------------------------------------------------------------------------
def _reference_forward(user_emb, item_emb, beta, c, user_ids, item_ids):
    u = jnp.take(user_emb, user_ids.reshape(-1), axis=0).astype(jnp.float32)
    v = jnp.take(item_emb, item_ids.reshape(-1), axis=0).astype(jnp.float32)
    sq_dist = jnp.sum((u - v) ** 2, axis=-1)
    sq_u = jnp.sum(u * u, axis=-1)
    sq_v = jnp.sum(v * v, axis=-1)
    eps = 1e-7
    denom = jnp.maximum(1.0 - sq_u, eps) * jnp.maximum(1.0 - sq_v, eps)
    t = 2.0 * sq_dist / denom
    d = jnp.log1p(t + jnp.sqrt(t * (t + 2.0)))            # arcosh(1+t), stable
    return (beta.reshape(-1)[0] * d + c.reshape(-1)[0]).reshape(-1)


# ----------------------------------------------------------------------------
if __name__ == "__main__":
    num_users, num_items, embedding_dim = 16, 16, 32
    batch = 8

    key = jax.random.PRNGKey(0)
    k_u, k_i, k_uid, k_iid = jax.random.split(key, 4)

    # reset_parameters(): uniform_(-0.001, 0.001)
    user_emb = jax.random.uniform(k_u, (num_users, embedding_dim), jnp.float32,
                                  minval=-0.001, maxval=0.001)
    item_emb = jax.random.uniform(k_i, (num_items, embedding_dim), jnp.float32,
                                  minval=-0.001, maxval=0.001)
    beta = jnp.array([1.5], dtype=jnp.float32)
    c = jnp.array([0.25], dtype=jnp.float32)
    user_ids = jax.random.randint(k_uid, (batch,), 0, num_users, dtype=jnp.int32)
    item_ids = jax.random.randint(k_iid, (batch,), 0, num_items, dtype=jnp.int32)

    ref = _reference_forward(user_emb, item_emb, beta, c, user_ids, item_ids)

    # 1) Primary path: table-resident VMEM gather.
    score = jax.block_until_ready(
        hyperbolic_embedding_forward(user_emb, item_emb, beta, c,
                                     user_ids, item_ids))
    assert score.shape == (batch,)
    assert bool(jnp.allclose(score, ref, atol=1e-4, rtol=1e-4)), (score, ref)

    # 2) Forced HBM fallback (single tile, partial tail, aggregate waits).
    score_hbm = jax.block_until_ready(
        hyperbolic_embedding_forward(user_emb, item_emb, beta, c,
                                     user_ids, item_ids, force_hbm=True))
    assert bool(jnp.allclose(score_hbm, ref, atol=1e-4, rtol=1e-4))

    # 3/4) Multi-tile checks: exercises the resident multi-tile path and the
    # HBM double-buffered path (prefetch-next + partial last tile).
    nu2, ni2, b2 = 96, 80, 600
    k2 = jax.random.PRNGKey(1)
    k_u2, k_i2, k_uid2, k_iid2 = jax.random.split(k2, 4)
    user_emb2 = jax.random.uniform(k_u2, (nu2, embedding_dim), jnp.float32,
                                   minval=-0.05, maxval=0.05)
    item_emb2 = jax.random.uniform(k_i2, (ni2, embedding_dim), jnp.float32,
                                   minval=-0.05, maxval=0.05)
    uids2 = jax.random.randint(k_uid2, (b2,), 0, nu2, dtype=jnp.int32)
    iids2 = jax.random.randint(k_iid2, (b2,), 0, ni2, dtype=jnp.int32)
    ref2 = _reference_forward(user_emb2, item_emb2, beta, c, uids2, iids2)
    for force in (False, True):
        out2 = jax.block_until_ready(
            hyperbolic_embedding_forward(user_emb2, item_emb2, beta, c,
                                         uids2, iids2, block_b=128,
                                         force_hbm=force))
        assert bool(jnp.allclose(out2, ref2, atol=1e-4, rtol=1e-4)), force

    # 5) Even-tile HBM case: two-way 'parallel' core split, no pad tail.
    b3 = 512
    uids3 = jax.random.randint(jax.random.PRNGKey(2), (b3,), 0, nu2, dtype=jnp.int32)
    iids3 = jax.random.randint(jax.random.PRNGKey(3), (b3,), 0, ni2, dtype=jnp.int32)
    ref3 = _reference_forward(user_emb2, item_emb2, beta, c, uids3, iids3)
    out3 = jax.block_until_ready(
        hyperbolic_embedding_forward(user_emb2, item_emb2, beta, c,
                                     uids3, iids3, block_b=128, force_hbm=True))
    assert bool(jnp.allclose(out3, ref3, atol=1e-4, rtol=1e-4))

    print("KERNEL_OK")
</pallas_src>

<mosaic_0001>
module attributes {stable_mosaic.version = 11 : i64} {
  func.func @_poincare_resident_kernel(%arg0: i32, %arg1: memref<128xi32, #tpu.memory_space<smem>>, %arg2: memref<128xi32, #tpu.memory_space<smem>>, %arg3: memref<16x32xf32, #tpu.memory_space<vmem>>, %arg4: memref<16x32xf32, #tpu.memory_space<vmem>>, %arg5: memref<1xf32, #tpu.memory_space<smem>>, %arg6: memref<1xf32, #tpu.memory_space<smem>>, %arg7: memref<1x1x128xf32, #tpu.memory_space<vmem>>, %arg8: memref<128x32xf32, #tpu.memory_space<vmem>>, %arg9: memref<128x32xf32, #tpu.memory_space<vmem>>) attributes {dimension_semantics = [#tpu.dimension_semantics<parallel>], iteration_bounds = array<i64: 1>, scalar_prefetch = 2 : i64, scratch_operands = 2 : i64, tpu.core_type = #tpu.core_type<tc>, window_params = [{pipeline_mode = #tpu.pipeline_mode<synchronous>, transform_indices = @transform_0, window_bounds = array<i64: 16, 32>}, {pipeline_mode = #tpu.pipeline_mode<synchronous>, transform_indices = @transform_1, window_bounds = array<i64: 16, 32>}, {transform_indices = @transform_2, window_bounds = array<i64: 1>}, {transform_indices = @transform_3, window_bounds = array<i64: 1>}, {transform_indices = @transform_4, window_bounds = array<i64: 1, 1, 128>}]} {
    %c128_i32 = arith.constant 128 : i32
    %0 = arith.muli %arg0, %c128_i32 : i32
    %c0_i32 = arith.constant 0 : i32
    %c32_i32 = arith.constant 32 : i32
    %1 = arith.addi %c0_i32, %c32_i32 : i32
    %c1_i32 = arith.constant 1 : i32
    scf.for %arg10 = %c0_i32 to %1 step %c1_i32  : i32 {
      %c1_i32_17 = arith.constant 1 : i32
      %40 = arith.muli %arg10, %c1_i32_17 : i32
      %c0_i32_18 = arith.constant 0 : i32
      %41 = arith.addi %c0_i32_18, %40 : i32
      %c4_i32 = arith.constant 4 : i32
      %42 = arith.muli %41, %c4_i32 : i32
      %43 = tpu.assume_multiple %42, 4 : i32
      %44 = arith.addi %0, %43 : i32
      %c0_i32_19 = arith.constant 0 : i32
      %45 = arith.addi %44, %c0_i32_19 : i32
      %46 = arith.index_cast %45 : i32 to index
      %47 = memref.load %arg1[%46] : memref<128xi32, #tpu.memory_space<smem>>
      %48 = arith.index_cast %45 : i32 to index
      %49 = memref.load %arg2[%48] : memref<128xi32, #tpu.memory_space<smem>>
      %50 = arith.index_cast %47 : i32 to index
      %c0_20 = arith.constant 0 : index
      %51 = vector.load %arg3[%50, %c0_20] : memref<16x32xf32, #tpu.memory_space<vmem>>, vector<1x32xf32>
      %c0_i32_21 = arith.constant 0 : i32
      %52 = arith.addi %43, %c0_i32_21 : i32
      %53 = arith.index_cast %52 : i32 to index
      %c0_22 = arith.constant 0 : index
      %54 = vector.load %arg8[%53, %c0_22] : memref<128x32xf32, #tpu.memory_space<vmem>>, vector<1x32xf32>
      tpu.vector_store %arg8[%53, %c0_22], %51 {strides = array<i32>} : memref<128x32xf32, #tpu.memory_space<vmem>>, vector<1x32xf32>,
      %55 = arith.index_cast %49 : i32 to index
      %c0_23 = arith.constant 0 : index
      %56 = vector.load %arg4[%55, %c0_23] : memref<16x32xf32, #tpu.memory_space<vmem>>, vector<1x32xf32>
      %c0_i32_24 = arith.constant 0 : i32
      %57 = arith.addi %43, %c0_i32_24 : i32
      %58 = arith.index_cast %57 : i32 to index
      %c0_25 = arith.constant 0 : index
      %59 = vector.load %arg9[%58, %c0_25] : memref<128x32xf32, #tpu.memory_space<vmem>>, vector<1x32xf32>
      tpu.vector_store %arg9[%58, %c0_25], %56 {strides = array<i32>} : memref<128x32xf32, #tpu.memory_space<vmem>>, vector<1x32xf32>,
      %60 = arith.addi %0, %43 : i32
      %c1_i32_26 = arith.constant 1 : i32
      %61 = arith.addi %60, %c1_i32_26 : i32
      %62 = arith.index_cast %61 : i32 to index
      %63 = memref.load %arg1[%62] : memref<128xi32, #tpu.memory_space<smem>>
      %64 = arith.index_cast %61 : i32 to index
      %65 = memref.load %arg2[%64] : memref<128xi32, #tpu.memory_space<smem>>
      %66 = arith.index_cast %63 : i32 to index
      %c0_27 = arith.constant 0 : index
      %67 = vector.load %arg3[%66, %c0_27] : memref<16x32xf32, #tpu.memory_space<vmem>>, vector<1x32xf32>
      %c1_i32_28 = arith.constant 1 : i32
      %68 = arith.addi %43, %c1_i32_28 : i32
      %69 = arith.index_cast %68 : i32 to index
      %c0_29 = arith.constant 0 : index
      %70 = vector.load %arg8[%69, %c0_29] : memref<128x32xf32, #tpu.memory_space<vmem>>, vector<1x32xf32>
      tpu.vector_store %arg8[%69, %c0_29], %67 {strides = array<i32>} : memref<128x32xf32, #tpu.memory_space<vmem>>, vector<1x32xf32>,
      %71 = arith.index_cast %65 : i32 to index
      %c0_30 = arith.constant 0 : index
      %72 = vector.load %arg4[%71, %c0_30] : memref<16x32xf32, #tpu.memory_space<vmem>>, vector<1x32xf32>
      %c1_i32_31 = arith.constant 1 : i32
      %73 = arith.addi %43, %c1_i32_31 : i32
      %74 = arith.index_cast %73 : i32 to index
      %c0_32 = arith.constant 0 : index
      %75 = vector.load %arg9[%74, %c0_32] : memref<128x32xf32, #tpu.memory_space<vmem>>, vector<1x32xf32>
      tpu.vector_store %arg9[%74, %c0_32], %72 {strides = array<i32>} : memref<128x32xf32, #tpu.memory_space<vmem>>, vector<1x32xf32>,
      %76 = arith.addi %0, %43 : i32
      %c2_i32 = arith.constant 2 : i32
      %77 = arith.addi %76, %c2_i32 : i32
      %78 = arith.index_cast %77 : i32 to index
      %79 = memref.load %arg1[%78] : memref<128xi32, #tpu.memory_space<smem>>
      %80 = arith.index_cast %77 : i32 to index
      %81 = memref.load %arg2[%80] : memref<128xi32, #tpu.memory_space<smem>>
      %82 = arith.index_cast %79 : i32 to index
      %c0_33 = arith.constant 0 : index
      %83 = vector.load %arg3[%82, %c0_33] : memref<16x32xf32, #tpu.memory_space<vmem>>, vector<1x32xf32>
      %c2_i32_34 = arith.constant 2 : i32
      %84 = arith.addi %43, %c2_i32_34 : i32
      %85 = arith.index_cast %84 : i32 to index
      %c0_35 = arith.constant 0 : index
      %86 = vector.load %arg8[%85, %c0_35] : memref<128x32xf32, #tpu.memory_space<vmem>>, vector<1x32xf32>
      tpu.vector_store %arg8[%85, %c0_35], %83 {strides = array<i32>} : memref<128x32xf32, #tpu.memory_space<vmem>>, vector<1x32xf32>,
      %87 = arith.index_cast %81 : i32 to index
      %c0_36 = arith.constant 0 : index
      %88 = vector.load %arg4[%87, %c0_36] : memref<16x32xf32, #tpu.memory_space<vmem>>, vector<1x32xf32>
      %c2_i32_37 = arith.constant 2 : i32
      %89 = arith.addi %43, %c2_i32_37 : i32
      %90 = arith.index_cast %89 : i32 to index
      %c0_38 = arith.constant 0 : index
      %91 = vector.load %arg9[%90, %c0_38] : memref<128x32xf32, #tpu.memory_space<vmem>>, vector<1x32xf32>
      tpu.vector_store %arg9[%90, %c0_38], %88 {strides = array<i32>} : memref<128x32xf32, #tpu.memory_space<vmem>>, vector<1x32xf32>,
      %92 = arith.addi %0, %43 : i32
      %c3_i32 = arith.constant 3 : i32
      %93 = arith.addi %92, %c3_i32 : i32
      %94 = arith.index_cast %93 : i32 to index
      %95 = memref.load %arg1[%94] : memref<128xi32, #tpu.memory_space<smem>>
      %96 = arith.index_cast %93 : i32 to index
      %97 = memref.load %arg2[%96] : memref<128xi32, #tpu.memory_space<smem>>
      %98 = arith.index_cast %95 : i32 to index
      %c0_39 = arith.constant 0 : index
      %99 = vector.load %arg3[%98, %c0_39] : memref<16x32xf32, #tpu.memory_space<vmem>>, vector<1x32xf32>
      %c3_i32_40 = arith.constant 3 : i32
      %100 = arith.addi %43, %c3_i32_40 : i32
      %101 = arith.index_cast %100 : i32 to index
      %c0_41 = arith.constant 0 : index
      %102 = vector.load %arg8[%101, %c0_41] : memref<128x32xf32, #tpu.memory_space<vmem>>, vector<1x32xf32>
      tpu.vector_store %arg8[%101, %c0_41], %99 {strides = array<i32>} : memref<128x32xf32, #tpu.memory_space<vmem>>, vector<1x32xf32>,
      %103 = arith.index_cast %97 : i32 to index
      %c0_42 = arith.constant 0 : index
      %104 = vector.load %arg4[%103, %c0_42] : memref<16x32xf32, #tpu.memory_space<vmem>>, vector<1x32xf32>
      %c3_i32_43 = arith.constant 3 : i32
      %105 = arith.addi %43, %c3_i32_43 : i32
      %106 = arith.index_cast %105 : i32 to index
      %c0_44 = arith.constant 0 : index
      %107 = vector.load %arg9[%106, %c0_44] : memref<128x32xf32, #tpu.memory_space<vmem>>, vector<1x32xf32>
      tpu.vector_store %arg9[%106, %c0_44], %104 {strides = array<i32>} : memref<128x32xf32, #tpu.memory_space<vmem>>, vector<1x32xf32>,
    }
    %c32_i32_0 = arith.constant 32 : i32
    %c0 = arith.constant 0 : index
    %c0_1 = arith.constant 0 : index
    %2 = vector.load %arg8[%c0, %c0_1] : memref<128x32xf32, #tpu.memory_space<vmem>>, vector<128x32xf32>
    %c0_2 = arith.constant 0 : index
    %c0_3 = arith.constant 0 : index
    %3 = vector.load %arg9[%c0_2, %c0_3] : memref<128x32xf32, #tpu.memory_space<vmem>>, vector<128x32xf32>
    %c0_4 = arith.constant 0 : index
    %4 = memref.load %arg5[%c0_4] : memref<1xf32, #tpu.memory_space<smem>>
    %c0_5 = arith.constant 0 : index
    %5 = memref.load %arg6[%c0_5] : memref<1xf32, #tpu.memory_space<smem>>
    %6 = vector.shape_cast %2 : vector<128x32xf32> to vector<1x128x32xf32>
    %7 = vector.shape_cast %3 : vector<128x32xf32> to vector<1x128x32xf32>
    %8 = arith.subf %6, %7 : vector<1x128x32xf32>
    %9 = arith.mulf %8, %8 : vector<1x128x32xf32>
    %cst = arith.constant dense<0.000000e+00> : vector<1x128xf32>
    %10 = vector.multi_reduction <add>, %9, %cst [2] : vector<1x128x32xf32> to vector<1x128xf32>
    %11 = arith.mulf %6, %6 : vector<1x128x32xf32>
    %cst_6 = arith.constant dense<0.000000e+00> : vector<1x128xf32>
    %12 = vector.multi_reduction <add>, %11, %cst_6 [2] : vector<1x128x32xf32> to vector<1x128xf32>
    %13 = arith.mulf %7, %7 : vector<1x128x32xf32>
    %cst_7 = arith.constant dense<0.000000e+00> : vector<1x128xf32>
    %14 = vector.multi_reduction <add>, %13, %cst_7 [2] : vector<1x128x32xf32> to vector<1x128xf32>
    %cst_8 = arith.constant 1.000000e+00 : f32
    %15 = vector.broadcast %cst_8 : f32 to vector<1x128xf32>
    %16 = arith.subf %15, %12 : vector<1x128xf32>
    %cst_9 = arith.constant 1.000000e-07 : f32
    %17 = vector.broadcast %cst_9 : f32 to vector<1x128xf32>
    %18 = arith.maximumf %16, %17 : vector<1x128xf32>
    %cst_10 = arith.constant 1.000000e+00 : f32
    %19 = vector.broadcast %cst_10 : f32 to vector<1x128xf32>
    %20 = arith.subf %19, %14 : vector<1x128xf32>
    %cst_11 = arith.constant 1.000000e-07 : f32
    %21 = vector.broadcast %cst_11 : f32 to vector<1x128xf32>
    %22 = arith.maximumf %20, %21 : vector<1x128xf32>
    %23 = arith.mulf %18, %22 : vector<1x128xf32>
    %cst_12 = arith.constant 2.000000e+00 : f32
    %24 = vector.broadcast %cst_12 : f32 to vector<1x128xf32>
    %25 = arith.mulf %24, %10 : vector<1x128xf32>
    %26 = arith.divf %25, %23 : vector<1x128xf32>
    %cst_13 = arith.constant 2.000000e+00 : f32
    %27 = vector.broadcast %cst_13 : f32 to vector<1x128xf32>
    %28 = arith.addf %26, %27 : vector<1x128xf32>
    %29 = arith.mulf %26, %28 : vector<1x128xf32>
    %30 = math.sqrt %29 : vector<1x128xf32>
    %31 = arith.addf %26, %30 : vector<1x128xf32>
    %32 = math.log1p %31 : vector<1x128xf32>
    %33 = vector.broadcast %4 : f32 to vector<1x128xf32>
    %34 = arith.mulf %33, %32 : vector<1x128xf32>
    %35 = vector.broadcast %5 : f32 to vector<1x128xf32>
    %36 = arith.addf %34, %35 : vector<1x128xf32>
    %c0_14 = arith.constant 0 : index
    %c0_15 = arith.constant 0 : index
    %c0_16 = arith.constant 0 : index
    %37 = vector.load %arg7[%c0_14, %c0_15, %c0_16] : memref<1x1x128xf32, #tpu.memory_space<vmem>>, vector<1x1x128xf32>
    %38 = vector.shape_cast %37 : vector<1x1x128xf32> to vector<1x128xf32>
    %39 = vector.shape_cast %36 : vector<1x128xf32> to vector<1x1x128xf32>
    tpu.vector_store %arg7[%c0_14, %c0_15, %c0_16], %39 {strides = array<i32>} : memref<1x1x128xf32, #tpu.memory_space<vmem>>, vector<1x1x128xf32>,
    return
  }
  func.func @transform_0(%arg0: i32, %arg1: memref<128xi32, #tpu.memory_space<smem>>, %arg2: memref<128xi32, #tpu.memory_space<smem>>) -> (i32, i32) {
    %c0_i32 = arith.constant 0 : i32
    %c0_i32_0 = arith.constant 0 : i32
    %c0_i32_1 = arith.constant 0 : i32
    return %c0_i32, %c0_i32_0 : i32, i32
  }
  func.func @transform_1(%arg0: i32, %arg1: memref<128xi32, #tpu.memory_space<smem>>, %arg2: memref<128xi32, #tpu.memory_space<smem>>) -> (i32, i32) {
    %c0_i32 = arith.constant 0 : i32
    %c0_i32_0 = arith.constant 0 : i32
    %c0_i32_1 = arith.constant 0 : i32
    return %c0_i32, %c0_i32_0 : i32, i32
  }
  func.func @transform_2(%arg0: i32, %arg1: memref<128xi32, #tpu.memory_space<smem>>, %arg2: memref<128xi32, #tpu.memory_space<smem>>) -> i32 {
    %c0_i32 = arith.constant 0 : i32
    %c0_i32_0 = arith.constant 0 : i32
    return %c0_i32 : i32
  }
  func.func @transform_3(%arg0: i32, %arg1: memref<128xi32, #tpu.memory_space<smem>>, %arg2: memref<128xi32, #tpu.memory_space<smem>>) -> i32 {
    %c0_i32 = arith.constant 0 : i32
    %c0_i32_0 = arith.constant 0 : i32
    return %c0_i32 : i32
  }
  func.func @transform_4(%arg0: i32, %arg1: memref<128xi32, #tpu.memory_space<smem>>, %arg2: memref<128xi32, #tpu.memory_space<smem>>) -> (i32, i32, i32) {
    %c0_i32 = arith.constant 0 : i32
    %c0_i32_0 = arith.constant 0 : i32
    %c0_i32_1 = arith.constant 0 : i32
    return %arg0, %c0_i32, %c0_i32_0 : i32, i32, i32
  }
}

</mosaic_0001>

<bundles_post_ra>
// kernel: hyperbolic_embedding_forward.1
= control target key start
LH: loop header
LB: loop body
LE: loop exit
PB: predicated region body
PF: predicated region fallthrough
CT: control target
= control target key end

     0   :  { %s2166_s0 = inlined_call_operand.hbm [shape: s32[128], index: 0, kind: input, shape index: {}]   ;;  %s2167_s2 = inlined_call_operand.hbm [shape: f32[16,32], index: 2, kind: input, shape index: {}]   ;;  %s2168_s3 = inlined_call_operand.hbm [shape: f32[16,32], index: 3, kind: input, shape index: {}]   ;;  %s2169_s4 = inlined_call_operand.<no memory space> [shape: f32[1], index: 4, kind: input, shape index: {}]   ;;  %s2170_s6 = inlined_call_operand.hbm [shape: f32[1,1,128], index: 6, kind: output, shape index: {}]   ;;  %s2171_s1 = inlined_call_operand.hbm [shape: s32[128], index: 1, kind: input, shape index: {}]   ;;  %s2172_s5 = inlined_call_operand.<no memory space> [shape: f32[1], index: 5, kind: input, shape index: {}]  }
   0x1   :  { %s1125_s23 = scalar_lea.hbm %s2166_s0, 16 }
   0x2   :  { %p1126_p0 = scmp.ne.s32.totalorder %s2166_s0, %s1125_s23  ;;  %p1129_p1 = scmp.lt.u32.totalorder %s1125_s23, %s2166_s0 }
   0x4   :  { %p1131_p2 = pnand %p1129_p1, %p1126_p0 }
   0x6   :  { %1134 = shalt.err (!%p1131_p2)  }
   0x7   :  { %s1227_s28 = smov [#allocation5]   ;;  %s1135_s9 = scalar_lea.hbm %s2171_s1, 16 }
   0x8   :  { %12 = dma.hbm_to_smem %s2166_s0, 16, %s1227_s28, [#allocation4] }
   0x9   :  { %p1136_p3 = scmp.ne.s32.totalorder %s2171_s1, %s1135_s9  ;;  %p1139_p4 = scmp.lt.u32.totalorder %s1135_s9, %s2171_s1 }
   0xb   :  { %p1141_p5 = pnand %p1139_p4, %p1136_p3 }
   0xd   :  { %1144 = shalt.err (!%p1141_p5)  }
   0xe   :  { %s1228_s14 = smov [#allocation6]   ;;  %15 = sst [smem:[#allocation7]] %s2169_s4 }
   0xf   :  { %14 = dma.hbm_to_smem %s2171_s1, 16, %s1228_s14, [#allocation4] }
  0x10   :  { %16 = sst [smem:[#allocation8]] %s2172_s5 }
  0x11   :  { %1215 = dma.done.wait [#allocation4], 32 }
  0x12   :  { %1216 = vsyncadd [#allocation4], 4294967264 }
  0x13   :  { %18 = sfence }
  0x14   :  { %19 = vsyncpa [#allocation10], 0 }
  0x15   :  { %20 = vsyncpa [#allocation13], 0 }
  0x16   :  { %21 = vsyncpa [#allocation11], 0  ;;  %s1229_s20 = smov [#allocation9]   ;;  %s1145_s1 = scalar_lea.hbm %s2167_s2, 256 }
  0x17   :  { %s27_s21 = sshll.u32 %s1229_s20, 4  ;;  %p1146_p6 = scmp.ne.s32.totalorder %s2167_s2, %s1145_s1  ;;  %s28_s21 = int_to_ptr.vmem [resolvable:$true] %s27_s21 }
  0x18   :  { %p1149_p7 = scmp.lt.u32.totalorder %s1145_s1, %s2167_s2 }
  0x1a   :  { %p1151_p8 = pnand %p1149_p7, %p1146_p6 }
  0x1c   :  { %1154 = shalt.err (!%p1151_p8)
}
  0x1d   :  { %s1155_s5 = scalar_lea.vmem %s28_s21, 256  ;;  %p1160_p10 = scmp.lt.s32.totalorder %s28_s21, %s28_s21 }
  0x1e   :  { %p1156_p9 = scmp.ne.s32.totalorder %s28_s21, %s1155_s5  ;;  %p1161_p11 = scmp.lt.s32.totalorder %s1155_s5, %s1155_s5 }
  0x20   :  { %p1162_p12 = por %p1161_p11, %p1160_p10 }
  0x22   :  { %p1163_p13 = pnand %p1162_p12, %p1156_p9 }
  0x24   :  { %1166 = shalt.err (!%p1163_p13)
}
  0x25   :  { %s1230_s27 = smov 128   ;;  %s1231_s28 = smov 8  }
  0x26   :  { %33 = dma.hbm_to_vmem [thread:$0]  %s2167_s2, 256, %s28_s21, [#allocation10], %s1230_s27, %s1230_s27, %s1231_s28  }
  0x27   :  { %s1232_s7 = smov [#allocation12]   ;;  %s1167_s11 = scalar_lea.hbm %s2168_s3, 256 }
  0x28   :  { %s39_s8 = sshll.u32 %s1232_s7, 4  ;;  %p1168_p0 = scmp.ne.s32.totalorder %s2168_s3, %s1167_s11  ;;  %s40_s8 = int_to_ptr.vmem [resolvable:$true] %s39_s8 }
  0x29   :  { %p1171_p1 = scmp.lt.u32.totalorder %s1167_s11, %s2168_s3 }
  0x2b   :  { %p1173_p2 = pnand %p1171_p1, %p1168_p0 }
  0x2d   :  { %1176 = shalt.err (!%p1173_p2)
}
  0x2e   :  { %s1177_s16 = scalar_lea.vmem %s40_s8, 256  ;;  %p1182_p4 = scmp.lt.s32.totalorder %s40_s8, %s40_s8 }
  0x2f   :  { %p1178_p3 = scmp.ne.s32.totalorder %s40_s8, %s1177_s16  ;;  %p1183_p5 = scmp.lt.s32.totalorder %s1177_s16, %s1177_s16 }
  0x31   :  { %p1184_p6 = por %p1183_p5, %p1182_p4 }
  0x33   :  { %p1185_p7 = pnand %p1184_p6, %p1178_p3 }
  0x35   :  { %1188 = shalt.err (!%p1185_p7)
}
  0x36   :  { %45 = dma.hbm_to_vmem [thread:$0]  %s2168_s3, 256, %s40_s8, [#allocation13], %s1230_s27, %s1230_s27, %s1231_s28  }
  0x37   :  { %1217 = dma.done.wait [#allocation10], 256  }
  0x38   :  { %1218 = vsyncadd [#allocation10], 4294967040 }
  0x39   :  { %1219 = dma.done.wait [#allocation13], 256  }
  0x3a   :  { %1220 = vsyncadd [#allocation13], 4294967040  ;;  %s1323_s17 = smov 0  }
  0x3b LB: > { %s1001_s18 = sshll.u32 %s1225_s17, 2  ;;  %vm70_vm0 = vcmask 253952   ;;  %s62_s17 = sadd.s32 1, %s1225_s17   ;;  %s1225_s17 = sphi %s1323_s17, %s62_s17  }
  0x3c   : > { %s65_s19 = sld [smem:[#allocation5 + %s1001_s18]]  ;;  %s76_s21 = sadd.s32 1, %s1001_s18 }
  0x3d   : > { %s66_s20 = sld [smem:[#allocation6 + %s1001_s18]]  ;;  %s88_s22 = sadd.s32 2, %s1001_s18 }
  0x3e   : > { %s77_s23 = sld [smem:[#allocation5 + %s76_s21]]  ;;  %s100_s25 = sadd.s32 3, %s1001_s18 }
  0x3f   : > { %s78_s1 = sld [smem:[#allocation6 + %s76_s21]]  ;;  %s69_s27 = scalar_lea.vmem [#allocation2], %s1001_s18 }
  0x40   : > { %s89_s3 = sld [smem:[#allocation5 + %s88_s22]]  ;;  %s74_s29 = scalar_lea.vmem [#allocation3], %s1001_s18 }
  0x41   : > { %s90_s24 = sld [smem:[#allocation6 + %s88_s22]]  ;;  %p59_p8 = scmp.ge.s32.totalorder %s62_s17, 32  }
  0x42   : > { %s101_s4 = sld [smem:[#allocation5 + %s100_s25]]  ;;  %s67_s26 = scalar_lea.vmem [#allocation9], %s65_s19  ;;  %vm178_vm1 = vcmask (%p59_p8), 261120  }
  0x43   : > { %v68_v0 = vld [vmem:[%s67_s26] sm:$0x1]  ;;  %s102_s5 = sld [smem:[#allocation6 + %s100_s25]]  ;;  %s72_s28 = scalar_lea.vmem [#allocation12], %s66_s20 }
  0x44   : > { %71 = vst.msk [vmem:[%s69_s27] sm:$0x1] %vm70_vm0, %v68_v0  ;;  %v73_v1 = vld [vmem:[%s72_s28] sm:$0x1]  ;;  %s79_s30 = scalar_lea.vmem [#allocation9], %s77_s23  ;;  %s1564_s12 = sld [smem:[#allocation7]] (%p59_p8) }
  0x45   : > { %75 = vst.msk [vmem:[%s74_s29] sm:$0x1] %vm70_vm0, %v73_v1  ;;  %v80_v2 = vld [vmem:[%s79_s30] sm:$0x1]  ;;  %s84_s7 = scalar_lea.vmem [#allocation12], %s78_s1  ;;  %61 = sbr.rel (!%p59_p8) target bundleno = 59 (0x3b), region = 67 }
  0x46   : > { %v85_v3 = vld [vmem:[%s84_s7] sm:$0x1]  ;;  %1003 = vst.msk [vmem:[%s69_s27 + $0x1] sm:$0x1] %vm70_vm0, %v80_v2  ;;  %s91_s8 = scalar_lea.vmem [#allocation9], %s89_s3  ;;  %s145_s13 = sld [smem:[#allocation8]] (%p59_p8) }
  0x47   : > { %1005 = vst.msk [vmem:[%s74_s29 + $0x1] sm:$0x1] %vm70_vm0, %v85_v3  ;;  %v92_v4 = vld [vmem:[%s91_s8] sm:$0x1]  ;;  %s96_s9 = scalar_lea.vmem [#allocation12], %s90_s24  ;;  %s1233_s14 = smov (%p59_p8), [#allocation14]  }
  0x48   : > { %v97_v5 = vld [vmem:[%s96_s9] sm:$0x1]  ;;  %1007 = vst.msk [vmem:[%s69_s27 + $0x2] sm:$0x1] %vm70_vm0, %v92_v4  ;;  %s103_s10 = scalar_lea.vmem [#allocation9], %s101_s4  ;;  %s956_s15 = sshll.u32 (%p59_p8), %s1233_s14, 4  ;;  %s957_s15 = int_to_ptr.vmem [resolvable:$true] %s956_s15 }
  0x49   : > { %1009 = vst.msk [vmem:[%s74_s29 + $0x2] sm:$0x1] %vm70_vm0, %v97_v5  ;;  %v104_v6 = vld [vmem:[%s103_s10] sm:$0x1]  ;;  %s108_s11 = scalar_lea.vmem [#allocation12], %s102_s5  ;;  %s1189_s16 = scalar_lea.vmem (%p59_p8), %s957_s15, 16 }
  0x4a   : > { %1011 = vst.msk [vmem:[%s69_s27 + $0x3] sm:$0x1] %vm70_vm0, %v104_v6  ;;  %v109_v7 = vld [vmem:[%s108_s11] sm:$0x1]  ;;  %p1190_p9 = scmp.ne.s32.totalorder (%p59_p8), %s957_s15, %s1189_s16  ;;  %s1193_s2 = scalar_lea.vmem (%p59_p8), %s957_s15, 32 }
  0x4b   : > { %1013 = vst.msk [vmem:[%s74_s29 + $0x3] sm:$0x1] %vm70_vm0, %v109_v7  ;;  %p1194_p10 = scmp.lt.s32.totalorder (%p59_p8), %s957_s15, %s957_s15  ;;  %p1195_p11 = scmp.lt.s32.totalorder (%p59_p8), %s1193_s2, %s1189_s16 }
  0x4d   :  { %p1196_p12 = por %p1195_p11, %p1194_p10 }
  0x4f   :  { %p1197_p13 = pnand %p1196_p12, %p1190_p9 }
  0x51   :  { %v1342_v9 = vld [vmem:[#allocation2] sm:$0xff]  ;;  %v1352_v14 = vld [vmem:[#allocation2 + $0x8] sm:$0xff]  ;;  %v1358_v17 = vld [vmem:[#allocation2 + $0x10] sm:$0xff] }
  0x52   :  { %v1340_v8 = vld [vmem:[#allocation3] sm:$0xff]  ;;  %v1344_v10 = vld [vmem:[#allocation3 + $0x8] sm:$0xff]  ;;  %v227_v12 = vmul.f32 %v1342_v9, %v1342_v9  ;;  %v228_v15 = vmul.f32 %v1352_v14, %v1352_v14  ;;  %v1356_v16 = vld [vmem:[#allocation3 + $0x10] sm:$0xff]  ;;  %v229_v23 = vmul.f32 %v1358_v17, %v1358_v17 }
  0x53   :  { %v291_v11 = vmul.f32 %v1340_v8, %v1340_v8  ;;  %v292_v13 = vmul.f32 %v1344_v10, %v1344_v10  ;;  %v293_v22 = vmul.f32 %v1356_v16, %v1356_v16  ;;  %v1368_v24 = vld [vmem:[#allocation3 + $0x18] sm:$0xff]  ;;  %v1378_v30 = vld [vmem:[#allocation3 + $0x20] sm:$0xff]  ;;  %v1388_v36 = vld [vmem:[#allocation3 + $0x28] sm:$0xff] }
  0x54   :  { %v243_v19 = vsel %vm178_vm1, %v227_v12, 0.0  ;;  %v246_v21 = vsel %vm178_vm1, %v228_v15, 0.0  ;;  %v1370_v25 = vld [vmem:[#allocation2 + $0x18] sm:$0xff]  ;;  %v249_v27 = vsel %vm178_vm1, %v229_v23, 0.0  ;;  %v294_v28 = vmul.f32 %v1368_v24, %v1368_v24  ;;  %v1380_v31 = vld [vmem:[#allocation2 + $0x20] sm:$0xff]  ;;  %v1390_v37 = vld [vmem:[#allocation2 + $0x28] sm:$0xff] }
  0x55   :  { %v307_v18 = vsel %vm178_vm1, %v291_v11, 0.0  ;;  %244 = vadd.xlane.f32.xlu0 %v243_v19  ;;  %v310_v20 = vsel %vm178_vm1, %v292_v13, 0.0  ;;  %v313_v26 = vsel %vm178_vm1, %v293_v22, 0.0  ;;  %v230_v29 = vmul.f32 %v1370_v25, %v1370_v25  ;;  %v1398_v42 = vld [vmem:[#allocation3 + $0x30] sm:$0xff]  ;;  %v1408_v48 = vld [vmem:[#allocation3 + $0x38] sm:$0xff]  ;;  %v1418_v54 = vld [vmem:[#allocation3 + $0x40] sm:$0xff] }
  0x56   :  { %308 = vadd.xlane.f32.xlu1 %v307_v18  ;;  %v316_v32 = vsel %vm178_vm1, %v294_v28, 0.0  ;;  %v295_v34 = vmul.f32 %v1378_v30, %v1378_v30  ;;  %v231_v35 = vmul.f32 %v1380_v31, %v1380_v31  ;;  %v296_v40 = vmul.f32 %v1388_v36, %v1388_v36  ;;  %v1400_v43 = vld [vmem:[#allocation2 + $0x30] sm:$0xff]  ;;  %v1410_v49 = vld [vmem:[#allocation2 + $0x38] sm:$0xff]  ;;  %v1420_v55 = vld [vmem:[#allocation2 + $0x40] sm:$0xff] }
  0x57   :  { %v252_v33 = vsel %vm178_vm1, %v230_v29, 0.0  ;;  %v232_v41 = vmul.f32 %v1390_v37, %v1390_v37  ;;  %v297_v46 = vmul.f32 %v1398_v42, %v1398_v42  ;;  %v233_v47 = vmul.f32 %v1400_v43, %v1400_v43  ;;  %v1428_v60 = vld [vmem:[#allocation3 + $0x48] sm:$0xff]  ;;  %v1438_v2 = vld [vmem:[#allocation3 + $0x50] sm:$0xff]  ;;  %v1448_v11 = vld [vmem:[#allocation3 + $0x58] sm:$0xff] }
  0x58   :  { %v319_v38 = vsel %vm178_vm1, %v295_v34, 0.0  ;;  %v255_v39 = vsel %vm178_vm1, %v231_v35, 0.0  ;;  %v322_v44 = vsel %vm178_vm1, %v296_v40, 0.0  ;;  %v298_v52 = vmul.f32 %v1408_v48, %v1408_v48  ;;  %v1430_v61 = vld [vmem:[#allocation2 + $0x48] sm:$0xff]  ;;  %v1440_v3 = vld [vmem:[#allocation2 + $0x50] sm:$0xff]  ;;  %v1450_v12 = vld [vmem:[#allocation2 + $0x58] sm:$0xff] }
  0x59   :  { %247 = vadd.xlane.f32.xlu0 %v246_v21  ;;  %v258_v45 = vsel %vm178_vm1, %v232_v41, 0.0  ;;  %v325_v50 = vsel %vm178_vm1, %v297_v46, 0.0  ;;  %v261_v51 = vsel %vm178_vm1, %v233_v47, 0.0  ;;  %v234_v53 = vmul.f32 %v1410_v49, %v1410_v49  ;;  %v1460_v21 = vld [vmem:[#allocation2 + $0x60] sm:$0xff]  ;;  %v1468_v28 = vld [vmem:[#allocation3 + $0x68] sm:$0xff]  ;;  %v143_v46 = vld [vmem:[#allocation3 + $0x78] sm:$0xff] }
  0x5a   :  { %311 = vadd.xlane.f32.xlu1 %v310_v20  ;;  %v328_v56 = vsel %vm178_vm1, %v298_v52, 0.0  ;;  %v299_v58 = vmul.f32 %v1418_v54, %v1418_v54  ;;  %v235_v59 = vmul.f32 %v1420_v55, %v1420_v55  ;;  %v300_v0 = vmul.f32 %v1428_v60, %v1428_v60  ;;  %v1458_v20 = vld [vmem:[#allocation3 + $0x60] sm:$0xff]  ;;  %v1470_v29 = vld [vmem:[#allocation2 + $0x68] sm:$0xff]  ;;  %v127_v47 = vld [vmem:[#allocation2 + $0x78] sm:$0xff] }
  0x5b   :  { %v264_v57 = vsel %vm178_vm1, %v234_v53, 0.0  ;;  %v236_v1 = vmul.f32 %v1430_v61, %v1430_v61  ;;  %v301_v6 = vmul.f32 %v1438_v2, %v1438_v2  ;;  %v237_v7 = vmul.f32 %v1440_v3, %v1440_v3 }
  0x5c   :  { %v331_v62 = vsel %vm178_vm1, %v299_v58, 0.0  ;;  %v267_v63 = vsel %vm178_vm1, %v235_v59, 0.0  ;;  %v334_v4 = vsel %vm178_vm1, %v300_v0, 0.0  ;;  %v302_v18 = vmul.f32 %v1448_v11, %v1448_v11 }
  0x5d   :  { %250 = vadd.xlane.f32.xlu0 %v249_v27  ;;  %v270_v5 = vsel %vm178_vm1, %v236_v1, 0.0  ;;  %v337_v13 = vsel %vm178_vm1, %v301_v6, 0.0  ;;  %v273_v15 = vsel %vm178_vm1, %v237_v7, 0.0  ;;  %v238_v19 = vmul.f32 %v1450_v12, %v1450_v12 }
  0x5e   :  { %314 = vadd.xlane.f32.xlu1 %v313_v26  ;;  %v340_v22 = vsel %vm178_vm1, %v302_v18, 0.0  ;;  %v303_v26 = vmul.f32 %v1458_v20, %v1458_v20  ;;  %v239_v27 = vmul.f32 %v1460_v21, %v1460_v21  ;;  %v304_v34 = vmul.f32 %v1468_v28, %v1468_v28 }
  0x5f   :  { %v276_v23 = vsel %vm178_vm1, %v238_v19, 0.0  ;;  %v240_v35 = vmul.f32 %v1470_v29, %v1470_v29  ;;  %v149_v0 = vsub.f32 %v1370_v25, %v1368_v24  ;;  %v157_v18 = vsub.f32 %v1450_v12, %v1448_v11 }
  0x60   :  { %v346_v40 = vsel %vm178_vm1, %v304_v34, 0.0  ;;  %v161_v12 = vsub.f32 %v127_v47, %v143_v46 }
  0x61   :  { %253 = vadd.xlane.f32.xlu0 %v252_v33  ;;  %v279_v33 = vsel %vm178_vm1, %v239_v27, 0.0  ;;  %v282_v41 = vsel %vm178_vm1, %v240_v35, 0.0  ;;  %v173_v19 = vmul.f32 %v157_v18, %v157_v18 }
  0x62   :  { %317 = vadd.xlane.f32.xlu1 %v316_v32  ;;  %v343_v32 = vsel %vm178_vm1, %v303_v26, 0.0 }
  0x65   :  { %256 = vadd.xlane.f32.xlu0 %v255_v39  ;;  %v1480_v39 = vld [vmem:[#allocation2 + $0x70] sm:$0xff] }
  0x66   :  { %320 = vadd.xlane.f32.xlu1 %v319_v38  ;;  %v1478_v38 = vld [vmem:[#allocation3 + $0x70] sm:$0xff] }
  0x67   :  { %v160_v27 = vsub.f32 %v1480_v39, %v1478_v38 }
  0x69   :  { %259 = vadd.xlane.f32.xlu0 %v258_v45  ;;  %v241_v45 = vmul.f32 %v1480_v39, %v1480_v39 }
  0x6a   :  { %323 = vadd.xlane.f32.xlu1 %v322_v44  ;;  %v305_v44 = vmul.f32 %v1478_v38, %v1478_v38 }
  0x6b   :  { %v285_v53 = vsel %vm178_vm1, %v241_v45, 0.0 }
  0x6c   :  { %v349_v52 = vsel %vm178_vm1, %v305_v44, 0.0 }
  0x6d   :  { %262 = vadd.xlane.f32.xlu0 %v261_v51  ;;  %v147_v51 = vsub.f32 %v1352_v14, %v1344_v10  ;;  %v148_v10 = vsub.f32 %v1358_v17, %v1356_v16  ;;  %v151_v14 = vsub.f32 %v1390_v37, %v1388_v36  ;;  %v153_v16 = vsub.f32 %v1410_v49, %v1408_v48 }
  0x6e   :  { %326 = vadd.xlane.f32.xlu1 %v325_v50  ;;  %v306_v50 = vmul.f32 %v143_v46, %v143_v46  ;;  %v155_v37 = vsub.f32 %v1430_v61, %v1428_v60  ;;  %v154_v48 = vsub.f32 %v1420_v55, %v1418_v54  ;;  %v156_v60 = vsub.f32 %v1440_v3, %v1438_v2 }
  0x6f   :  { %v163_v59 = vmul.f32 %v147_v51, %v147_v51  ;;  %v167_v24 = vmul.f32 %v151_v14, %v151_v14  ;;  %v159_v54 = vsub.f32 %v1470_v29, %v1468_v28  ;;  %v212_v2 = vsel %vm178_vm1, %v173_v19, 0.0 }
  0x70   :  { %v352_v58 = vsel %vm178_vm1, %v306_v50, 0.0 }
  0x71   :  { %265 = vadd.xlane.f32.xlu0 %v264_v57  ;;  %v146_v57 = vsub.f32 %v1342_v9, %v1340_v8  ;;  %v150_v8 = vsub.f32 %v1380_v31, %v1378_v30  ;;  %v182_v9 = vsel %vm178_vm1, %v163_v59, 0.0  ;;  %v152_v30 = vsub.f32 %v1400_v43, %v1398_v42 }
  0x72   :  { %329 = vadd.xlane.f32.xlu1 %v328_v56  ;;  %v242_v56 = vmul.f32 %v127_v47, %v127_v47  ;;  %v169_v31 = vmul.f32 %v153_v16, %v153_v16  ;;  %v194_v6 = vsel %vm178_vm1, %v167_v24, 0.0  ;;  %v170_v43 = vmul.f32 %v154_v48, %v154_v48 }
  0x73   :  { %v166_v36 = vmul.f32 %v150_v8, %v150_v8  ;;  %v175_v11 = vmul.f32 %v159_v54, %v159_v54 }
  0x74   :  { %v200_v49 = vsel %vm178_vm1, %v169_v31, 0.0  ;;  %v203_v55 = vsel %vm178_vm1, %v170_v43, 0.0 }
  0x75   :  { %268 = vadd.xlane.f32.xlu0 %v267_v63  ;;  %v162_v63 = vmul.f32 %v146_v57, %v146_v57  ;;  %v191_v7 = vsel %vm178_vm1, %v166_v36, 0.0  ;;  %v218_v28 = vsel %vm178_vm1, %v175_v11, 0.0 }
  0x76   :  { %332 = vadd.xlane.f32.xlu1 %v331_v62  ;;  %v288_v62 = vsel %vm178_vm1, %v242_v56, 0.0 }
  0x77   :  { %v179_v1 = vsel %vm178_vm1, %v162_v63, 0.0 }
  0x79   :  { %271 = vadd.xlane.f32.xlu0 %v270_v5  ;;  %v164_v5 = vmul.f32 %v148_v10, %v148_v10 }
  0x7a   :  { %335 = vadd.xlane.f32.xlu1 %v334_v4  ;;  %v165_v4 = vmul.f32 %v149_v0, %v149_v0 }
  0x7b   :  { %v185_v25 = vsel %vm178_vm1, %v164_v5, 0.0 }
  0x7c   :  { %v188_v17 = vsel %vm178_vm1, %v165_v4, 0.0 }
  0x7d   :  { %274 = vadd.xlane.f32.xlu0 %v273_v15  ;;  %v171_v15 = vmul.f32 %v155_v37, %v155_v37 }
  0x7e   :  { %338 = vadd.xlane.f32.xlu1 %v337_v13  ;;  %v168_v13 = vmul.f32 %v152_v30, %v152_v30 }
  0x7f   :  { %v206_v61 = vsel %vm178_vm1, %v171_v15, 0.0 }
  0x80   :  { %v197_v42 = vsel %vm178_vm1, %v168_v13, 0.0 }
  0x81   :  { %277 = vadd.xlane.f32.xlu0 %v276_v23  ;;  %v158_v23 = vsub.f32 %v1460_v21, %v1458_v20  ;;  %v176_v20 = vmul.f32 %v160_v27, %v160_v27 }
  0x82   :  { %341 = vadd.xlane.f32.xlu1 %v340_v22  ;;  %v172_v22 = vmul.f32 %v156_v60, %v156_v60 }
  0x83   :  { %v174_v26 = vmul.f32 %v158_v23, %v158_v23 }
  0x84   :  { %v209_v3 = vsel %vm178_vm1, %v172_v22, 0.0 }
  0x85   :  { %280 = vadd.xlane.f32.xlu0 %v279_v33  ;;  %v215_v29 = vsel %vm178_vm1, %v174_v26, 0.0  ;;  %v221_v33 = vsel %vm178_vm1, %v176_v20, 0.0 }
  0x86   :  { %344 = vadd.xlane.f32.xlu1 %v343_v32  ;;  %v177_v32 = vmul.f32 %v161_v12, %v161_v12 }
  0x88   :  { %v224_v21 = vsel %vm178_vm1, %v177_v32, 0.0 }
  0x89   :  { %283 = vadd.xlane.f32.xlu0 %v282_v41 }
  0x8a   :  { %347 = vadd.xlane.f32.xlu1 %v346_v40 }
  0x8d   :  { %286 = vadd.xlane.f32.xlu0 %v285_v53 }
  0x8e   :  { %350 = vadd.xlane.f32.xlu1 %v349_v52 }
  0x91   :  { %289 = vadd.xlane.f32.xlu0 %v288_v62 }
  0x92   :  { %353 = vadd.xlane.f32.xlu1 %v352_v58 }
  0x95   :  { %180 = vadd.xlane.f32.xlu0 %v179_v1 }
  0x96   :  { %183 = vadd.xlane.f32.xlu1 %v182_v9 }
  0x99   :  { %186 = vadd.xlane.f32.xlu0 %v185_v25 }
  0x9a   :  { %189 = vadd.xlane.f32.xlu1 %v188_v17 }
  0x9d   :  { %192 = vadd.xlane.f32.xlu0 %v191_v7 }
  0x9e   :  { %195 = vadd.xlane.f32.xlu1 %v194_v6 }
  0xa1   :  { %198 = vadd.xlane.f32.xlu0 %v197_v42 }
  0xa2   :  { %201 = vadd.xlane.f32.xlu1 %v200_v49  ;;  %v837_v49 = vlaneseq }
  0xa5   :  { %204 = vadd.xlane.f32.xlu0 %v203_v55 }
  0xa6   :  { %207 = vadd.xlane.f32.xlu1 %v206_v61 }
  0xa9   :  { %210 = vadd.xlane.f32.xlu0 %v209_v3  ;;  %v1562_v3 = vand.u32 127, %v837_v49 }
  0xaa   :  { %213 = vadd.xlane.f32.xlu1 %v212_v2 }
  0xad   :  { %216 = vadd.xlane.f32.xlu0 %v215_v29 }
  0xae   :  { %219 = vadd.xlane.f32.xlu1 %v218_v28 }
  0xb1   :  { %222 = vadd.xlane.f32.xlu0 %v221_v33 }
  0xb2   :  { %225 = vadd.xlane.f32.xlu1 %v224_v21 }
  0xe2   :  { %v245_v35 = vpop.xlane.xlu0 %244 }
  0xe3   :  { %v309_v34 = vpop.xlane.xlu1 %308  ;;  %v355_v8 = vsub.f32 1.0, %v245_v35 }
  0xe4   :  { %v387_v14 = vsub.f32 1.0, %v309_v34 }
  0xe5   :  { %v371_v16 = vmax.f32 %v355_v8, 1e-07 }
  0xe6   :  { %v248_v38 = vpop.xlane.xlu0 %247  ;;  %v403_v24 = vmax.f32 %v387_v14, 1e-07 }
  0xe7   :  { %v312_v40 = vpop.xlane.xlu1 %311  ;;  %v356_v1 = vsub.f32 1.0, %v248_v38 }
  0xe8   :  { %v388_v9 = vsub.f32 1.0, %v312_v40  ;;  %v419_v13 = vmul.f32 %v403_v24, %v371_v16 }
  0xe9   :  { %v372_v25 = vmax.f32 %v356_v1, 1e-07  ;;  %v1592_v1 = vstv %s145_s13 }
  0xea   :  { %v251_v41 = vpop.xlane.xlu0 %250  ;;  %v404_v17 = vmax.f32 %v388_v9, 1e-07  ;;  %1029 = vrcp.f32 %v419_v13  ;;  %v1590_v9 = vstv %s1564_s12 }
  0xeb   :  { %v315_v39 = vpop.xlane.xlu1 %314  ;;  %v357_v30 = vsub.f32 1.0, %v251_v41 }
  0xec   :  { %v389_v36 = vsub.f32 1.0, %v315_v39  ;;  %v420_v48 = vmul.f32 %v404_v17, %v372_v25 }
  0xed   :  { %v373_v42 = vmax.f32 %v357_v30, 1e-07 }
  0xee   :  { %v254_v45 = vpop.xlane.xlu0 %253  ;;  %v405_v15 = vmax.f32 %v389_v36, 1e-07  ;;  %1031 = vrcp.f32 %v420_v48  ;;  %v1603_v48 = vadd.s32 4294967256, %v1562_v3 }
  0xef   :  { %v318_v44 = vpop.xlane.xlu1 %317  ;;  %v358_v37 = vsub.f32 1.0, %v254_v45 }
  0xf0   :  { %v390_v31 = vsub.f32 1.0, %v318_v44  ;;  %v421_v26 = vmul.f32 %v405_v15, %v373_v42 }
  0xf1   :  { %v374_v61 = vmax.f32 %v358_v37, 1e-07 }
  0xf2   :  { %v257_v47 = vpop.xlane.xlu0 %256  ;;  %v406_v60 = vmax.f32 %v390_v31, 1e-07  ;;  %1033 = vrcp.f32 %v421_v26 }
  0xf3   :  { %v321_v46 = vpop.xlane.xlu1 %320  ;;  %v359_v18 = vsub.f32 1.0, %v257_v47 }
  0xf4   :  { %v391_v43 = vsub.f32 1.0, %v321_v46  ;;  %v422_v29 = vmul.f32 %v406_v60, %v374_v61  ;;  %v1030_v36 = vpop.eup %1029 }
  0xf5   :  { %v375_v28 = vmax.f32 %v359_v18, 1e-07 }
  0xf6   :  { %v260_v51 = vpop.xlane.xlu0 %259  ;;  %v407_v27 = vmax.f32 %v391_v43, 1e-07  ;;  %1035 = vrcp.f32 %v422_v29  ;;  %v1616_v29 = vadd.s32 4294967264, %v1562_v3 }
  0xf7   :  { %v324_v50 = vpop.xlane.xlu1 %323  ;;  %v360_v55 = vsub.f32 1.0, %v260_v51  ;;  %v1579_v51 = vadd.s32 4294967288, %v1562_v3 }
  0xf8   :  { %v392_v54 = vsub.f32 1.0, %v324_v50  ;;  %v423_v44 = vmul.f32 %v407_v27, %v375_v28  ;;  %v1576_v50 = vshrl.u32 %v837_v49, 7 }
  0xf9   :  { %v376_v20 = vmax.f32 %v360_v55, 1e-07 }
  0xfa   :  { %v263_v53 = vpop.xlane.xlu0 %262  ;;  %v408_v32 = vmax.f32 %v392_v54, 1e-07  ;;  %1037 = vrcp.f32 %v423_v44  ;;  %v846_v24 = vsub.s32 %v1579_v51, %v1576_v50  ;;  %v841_v17 = vsub.s32 %v1562_v3, %v1576_v50 }
  0xfb   :  { %v327_v52 = vpop.xlane.xlu1 %326  ;;  %v361_v11 = vsub.f32 1.0, %v263_v53  ;;  %v1582_v53 = vadd.s32 4294967272, %v1562_v3 }
  0xfc   :  { %v393_v23 = vsub.f32 1.0, %v327_v52  ;;  %v424_v45 = vmul.f32 %v408_v32, %v376_v20 }
  0xfd   :  { %v377_v35 = vmax.f32 %v361_v11, 1e-07 }
  0xfe   :  { %v266_v57 = vpop.xlane.xlu0 %265  ;;  %v409_v34 = vmax.f32 %v393_v23, 1e-07  ;;  %1039 = vrcp.f32 %v424_v45 }
  0xff   :  { %v330_v56 = vpop.xlane.xlu1 %329  ;;  %v362_v2 = vsub.f32 1.0, %v266_v57 }
 0x100   :  { %v394_v12 = vsub.f32 1.0, %v330_v56  ;;  %v425_v52 = vmul.f32 %v409_v34, %v377_v35 }
 0x101   :  { %v378_v38 = vmax.f32 %v362_v2, 1e-07 }
 0x102   :  { %v1540_v59 = vpop.xlane.xlu0 %268  ;;  %v410_v40 = vmax.f32 %v394_v12, 1e-07  ;;  %1041 = vrcp.f32 %v425_v52 }
 0x103   :  { %v1538_v58 = vpop.xlane.xlu1 %332  ;;  %v363_v41 = vsub.f32 1.0, %v1540_v59  ;;  %v1585_v59 = vadd.s32 4294967280, %v1562_v3 }
 0x104   :  { %v395_v39 = vsub.f32 1.0, %v1538_v58  ;;  %v426_v56 = vmul.f32 %v410_v40, %v378_v38 }
 0x105   :  { %v379_v58 = vmax.f32 %v363_v41, 1e-07  ;;  %v853_v13 = vsub.s32 %v1585_v59, %v1576_v50 }
 0x106   :  { %v1544_v63 = vpop.xlane.xlu0 %271  ;;  %v411_v57 = vmax.f32 %v395_v39, 1e-07  ;;  %1043 = vrcp.f32 %v426_v56  ;;  %v1637_v56 = vadd.s32 4294967232, %v1562_v3 }
 0x107   :  { %v1542_v62 = vpop.xlane.xlu1 %335  ;;  %v364_v8 = vsub.f32 1.0, %v1544_v63  ;;  %v1032_v63 = vpop.eup %1031 }
 0x108   :  { %v396_v14 = vsub.f32 1.0, %v1542_v62  ;;  %v860_v62 = vsub.s32 %v1582_v53, %v1576_v50  ;;  %v427_v37 = vmul.f32 %v411_v57, %v379_v58  ;;  %v1034_v11 = vpop.eup %1033 }
 0x109   :  { %v380_v15 = vmax.f32 %v364_v8, 1e-07  ;;  %v1036_v28 = vpop.eup %1035 }
 0x10a   :  { %v1548_v10 = vpop.xlane.xlu0 %274  ;;  %v412_v49 = vmax.f32 %v396_v14, 1e-07  ;;  %1045 = vrcp.f32 %v427_v37  ;;  %v1038_v44 = vpop.eup %1037 }
 0x10b   :  { %v1546_v0 = vpop.xlane.xlu1 %338  ;;  %v365_v60 = vsub.f32 1.0, %v1548_v10  ;;  %v1622_v10 = vadd.s32 4294967248, %v1562_v3  ;;  %v1040_v57 = vpop.eup %1039 }
 0x10c   :  { %v397_v18 = vsub.f32 1.0, %v1546_v0  ;;  %v1619_v0 = vadd.s32 4294967240, %v1562_v3  ;;  %v428_v34 = vmul.f32 %v412_v49, %v380_v15 }
 0x10d   :  { %v381_v40 = vmax.f32 %v365_v60, 1e-07 }
 0x10e   :  { %v1552_v5 = vpop.xlane.xlu0 %277  ;;  %v413_v35 = vmax.f32 %v397_v18, 1e-07 }
 0x10f   :  { %v1550_v4 = vpop.xlane.xlu1 %341  ;;  %v366_v54 = vsub.f32 1.0, %v1552_v5 }
 0x110   :  { %v398_v61 = vsub.f32 1.0, %v1550_v4 }
 0x111   :  { %v382_v52 = vmax.f32 %v366_v54, 1e-07 }
 0x112   :  { %v1556_v7 = vpop.xlane.xlu0 %280  ;;  %v414_v45 = vmax.f32 %v398_v61, 1e-07 }
 0x113   :  { %v1554_v6 = vpop.xlane.xlu1 %344  ;;  %v367_v58 = vsub.f32 1.0, %v1556_v7  ;;  %v1646_v7 = vadd.s32 4294967224, %v1562_v3 }
 0x114   :  { %v399_v38 = vsub.f32 1.0, %v1554_v6  ;;  %v1042_v6 = vpop.eup %1041  ;;  %v430_v60 = vmul.f32 %v414_v45, %v382_v52 }
 0x115   :  { %v383_v61 = vmax.f32 %v367_v58, 1e-07 }
 0x116   :  { %v1560_v22 = vpop.xlane.xlu0 %283  ;;  %v415_v37 = vmax.f32 %v399_v38, 1e-07 }
 0x117   :  { %v1558_v19 = vpop.xlane.xlu1 %347  ;;  %v368_v8 = vsub.f32 1.0, %v1560_v22 }
 0x118   :  { %v400_v14 = vsub.f32 1.0, %v1558_v19 }
 0x11a   :  { %v1568_v33 = vpop.xlane.xlu0 %286  ;;  %v416_v54 = vmax.f32 %v400_v14, 1e-07 }
 0x11b   :  { %v1566_v21 = vpop.xlane.xlu1 %350 }
 0x11c   :  { %v401_v52 = vsub.f32 1.0, %v1566_v21 }
 0x11e   :  { %v1574_v47 = vpop.xlane.xlu0 %289 }
 0x11f   :  { %v1572_v46 = vpop.xlane.xlu1 %353 }
 0x122   :  { %v181_v25 = vpop.xlane.xlu0 %180 }
 0x123   :  { %v184_v16 = vpop.xlane.xlu1 %183  ;;  %v435_v31 = vmul.f32 2.0, %v181_v25 }
 0x124   :  { %v436_v30 = vmul.f32 2.0, %v184_v16 }
 0x125   :  { %v1607_v43 = vmul.f32 %v1030_v36, %v435_v31  ;;  %v1044_v31 = vpop.eup %1043 }
 0x126   :  { %v1605_v42 = vmul.f32 %v1032_v63, %v436_v30  ;;  %v187_v23 = vpop.xlane.xlu0 %186  ;;  %v429_v63 = vmul.f32 %v413_v35, %v381_v40 }
 0x127   :  { %v190_v55 = vpop.xlane.xlu1 %189  ;;  %v483_v2 = vadd.f32 2.0, %v1607_v43  ;;  %v437_v27 = vmul.f32 2.0, %v187_v23 }
 0x128   :  { %v484_v12 = vadd.f32 2.0, %v1605_v42  ;;  %v438_v26 = vmul.f32 2.0, %v190_v55  ;;  %v384_v55 = vmax.f32 %v368_v8, 1e-07 }
 0x129   :  { %v1628_v5 = vmul.f32 %v483_v2, %v1607_v43  ;;  %v1632_v20 = vmul.f32 %v1034_v11, %v437_v27  ;;  %v874_v11 = vsub.s32 %v1603_v48, %v1576_v50  ;;  %v888_v27 = vsub.s32 %v1619_v0, %v1576_v50 }
 0x12a   :  { %v1625_v4 = vmul.f32 %v484_v12, %v1605_v42  ;;  %v1630_v32 = vmul.f32 %v1036_v28, %v438_v26  ;;  %v193_v41 = vpop.xlane.xlu0 %192  ;;  %v867_v12 = vsub.s32 %v1616_v29, %v1576_v50  ;;  %v1663_v26 = vpop.eup %1045  ;;  %v881_v28 = vsub.s32 %v1622_v10, %v1576_v50 }
 0x12b   :  { %v196_v39 = vpop.xlane.xlu1 %195  ;;  %v485_v25 = vadd.f32 2.0, %v1632_v20  ;;  %v439_v30 = vmul.f32 2.0, %v193_v41  ;;  %v432_v41 = vmul.f32 %v416_v54, %v384_v55  ;;  %vm517_vm4 = vcmp.eq.f32.partialorder %v1628_v5, inf }
 0x12c   :  { %1047 = vrsqrt.f32 %v1625_v4  ;;  %v486_v16 = vadd.f32 2.0, %v1630_v32  ;;  %v440_v36 = vmul.f32 2.0, %v196_v39  ;;  %v431_v39 = vmul.f32 %v415_v37, %v383_v61 }
 0x12d   :  { %1049 = vrsqrt.f32 %v1628_v5  ;;  %v1652_v22 = vmul.f32 %v485_v25, %v1632_v20  ;;  %v1656_v18 = vmul.f32 %v1038_v44, %v439_v30  ;;  %vm524_vm2 = vcmp.eq.f32.partialorder %v1625_v4, inf }
 0x12e   :  { %1051 = vrcp.f32 %v428_v34  ;;  %v1649_v19 = vmul.f32 %v486_v16, %v1630_v32  ;;  %v1654_v15 = vmul.f32 %v1040_v57, %v440_v36  ;;  %v199_v23 = vpop.xlane.xlu0 %198  ;;  %v895_v34 = vsub.s32 %v1637_v56, %v1576_v50 }
 0x12f   :  { %v202_v49 = vpop.xlane.xlu1 %201  ;;  %v487_v40 = vadd.f32 2.0, %v1656_v18  ;;  %v441_v38 = vmul.f32 2.0, %v199_v23  ;;  %v369_v16 = vsub.f32 1.0, %v1568_v33  ;;  %vm526_vm3 = vcmp.eq.f32.partialorder %v1625_v4, 0.0 }
 0x130   :  { %1053 = vrsqrt.f32 %v1649_v19  ;;  %v442_v2 = vmul.f32 2.0, %v202_v49  ;;  %v488_v35 = vadd.f32 2.0, %v1654_v15  ;;  %v527_v36 = vand.u32 2147483648, %v1625_v4 }
 0x131   :  { %1055 = vrsqrt.f32 %v1652_v22  ;;  %v1681_v58 = vmul.f32 %v487_v40, %v1656_v18  ;;  %v1692_v30 = vmul.f32 %v1042_v6, %v441_v38  ;;  %v520_v33 = vand.u32 2147483648, %v1628_v5 }
 0x132   :  { %1057 = vrcp.f32 %v429_v63  ;;  %v1678_v57 = vmul.f32 %v488_v35, %v1654_v15  ;;  %v1683_v14 = vmul.f32 %v1044_v31, %v442_v2  ;;  %vm519_vm5 = vcmp.eq.f32.partialorder %v1628_v5, 0.0 }
 0x133   :  { %1059 = vrcp.f32 %v430_v60  ;;  %v489_v23 = vadd.f32 2.0, %v1692_v30  ;;  %v208_v2 = vpop.xlane.xlu1 %207  ;;  %v417_v40 = vmax.f32 %v401_v52, 1e-07  ;;  %v385_v38 = vmax.f32 %v369_v16, 1e-07 }
 0x134   :  { %1061 = vrsqrt.f32 %v1678_v57  ;;  %v490_v60 = vadd.f32 2.0, %v1683_v14  ;;  %vm538_vm6 = vcmp.eq.f32.partialorder %v1649_v19, inf  ;;  %v402_v52 = vsub.f32 1.0, %v1572_v46 }
 0x135   :  { %1063 = vrsqrt.f32 %v1681_v58  ;;  %vm531_vm7 = vcmp.eq.f32.partialorder %v1652_v22, inf  ;;  %vm540_vm8 = vcmp.eq.f32.partialorder %v1649_v19, 0.0  ;;  %vm533_vm9 = vcmp.eq.f32.partialorder %v1652_v22, 0.0 }
 0x136   :  { %v1048_v45 = vpop.eup %1047  ;;  %1065 = vrcp.f32 %v431_v39  ;;  %vm552_vm10 = vcmp.eq.f32.partialorder %v1678_v57, inf  ;;  %vm554_vm11 = vcmp.eq.f32.partialorder %v1678_v57, 0.0  ;;  %vm545_vm12 = vcmp.eq.f32.partialorder %v1681_v58, inf }
 0x137   :  { %v1050_v8 = vpop.eup %1049  ;;  %v523_v25 = vmul.f32 %v1048_v45, %v1625_v4  ;;  %1067 = vrcp.f32 %v432_v41  ;;  %vm547_vm13 = vcmp.eq.f32.partialorder %v1681_v58, 0.0 }
 0x138   :  { %v516_v21 = vmul.f32 %v1050_v8, %v1628_v5  ;;  %v1052_v63 = vpop.eup %1051  ;;  %v1722_v8 = vmul.f32 %v490_v60, %v1683_v14 }
 0x139   :  { %v525_v31 = vsel %vm524_vm2, %v1625_v4, %v523_v25  ;;  %v1705_v4 = vadd.s32 4294967216, %v1562_v3 }
 0x13a   :  { %v528_v37 = vsel %vm526_vm3, %v527_v36, %v525_v31  ;;  %v518_v49 = vsel %vm517_vm4, %v1628_v5, %v516_v21  ;;  %v1054_v54 = vpop.eup %1053  ;;  %v1712_v5 = vadd.s32 4294967208, %v1562_v3  ;;  %v541_v36 = vand.u32 2147483648, %v1649_v19 }
 0x13b   :  { %v1702_v6 = vadd.f32 %v528_v37, %v1605_v42  ;;  %v521_v61 = vsel %vm519_vm5, %v520_v33, %v518_v49  ;;  %v1056_v35 = vpop.eup %1055  ;;  %v537_v39 = vmul.f32 %v1054_v54, %v1649_v19  ;;  %v444_v21 = vmul.f32 2.0, %v208_v2 }
 0x13c   :  { %v1708_v55 = vadd.f32 %v521_v61, %v1607_v43  ;;  %v1716_v45 = vpop.eup %1057  ;;  %v530_v43 = vmul.f32 %v1056_v35, %v1652_v22  ;;  %v534_v31 = vand.u32 2147483648, %v1652_v22  ;;  %v1732_v33 = vmul.f32 %v489_v23, %v1692_v30 }
 0x13d   :  { %v652_v42 = vadd.f32 1.0, %v1702_v6  ;;  %v1724_v25 = vpop.eup %1059  ;;  %v539_v16 = vsel %vm538_vm6, %v1649_v19, %v537_v39  ;;  %v433_v49 = vmul.f32 %v417_v40, %v385_v38  ;;  %v418_v2 = vmax.f32 %v402_v52, 1e-07 }
 0x13e   :  { %v643_v41 = vadd.f32 1.0, %v1708_v55  ;;  %v532_v37 = vsel %vm531_vm7, %v1652_v22, %v530_v43  ;;  %v1062_v46 = vpop.eup %1061  ;;  %v542_v60 = vsel %vm540_vm8, %v541_v36, %v539_v16  ;;  %v370_v35 = vsub.f32 1.0, %v1574_v47 }
 0x13f   :  { %1069 = vlog2.f32 %v652_v42  ;;  %v535_v61 = vsel %vm533_vm9, %v534_v31, %v532_v37  ;;  %v1064_v54 = vpop.eup %1063  ;;  %v1742_v42 = vmul.f32 %v1052_v63, %v444_v21  ;;  %v551_v19 = vmul.f32 %v1062_v46, %v1678_v57  ;;  %v205_v63 = vpop.xlane.xlu0 %204 }
 0x140   :  { %1071 = vlog2.f32 %v643_v41  ;;  %v1740_v23 = vadd.f32 %v535_v61, %v1632_v20  ;;  %v544_v22 = vmul.f32 %v1064_v54, %v1681_v58  ;;  %v1748_v40 = vpop.eup %1065  ;;  %v655_v38 = vmul.f32 -0.5, %v1702_v6 }
 0x141   :  { %1073 = vrsqrt.f32 %v1722_v8  ;;  %v646_v39 = vmul.f32 -0.5, %v1708_v55  ;;  %v1753_v47 = vadd.f32 %v542_v60, %v1630_v32  ;;  %v555_v20 = vand.u32 2147483648, %v1678_v57  ;;  %v1756_v41 = vpop.eup %1067 }
 0x142   :  { %1075 = vrsqrt.f32 %v1732_v33  ;;  %v661_v43 = vadd.f32 1.0, %v1740_v23  ;;  %v553_v52 = vsel %vm552_vm10, %v1678_v57, %v551_v19  ;;  %v386_v16 = vmax.f32 %v370_v35, 1e-07 }
 0x143   :  { %v556_v36 = vsel %vm554_vm11, %v555_v20, %v553_v52  ;;  %v546_v21 = vsel %vm545_vm12, %v1681_v58, %v544_v22  ;;  %v492_v32 = vadd.f32 2.0, %v1742_v42  ;;  %v658_v31 = vand.u32 2147483647, %v1702_v6 }
 0x144   :  { %v649_v37 = vand.u32 2147483647, %v1708_v55  ;;  %v548_v46 = vand.u32 2147483648, %v1681_v58  ;;  %v443_v60 = vmul.f32 2.0, %v205_v63  ;;  %v656_v61 = vadd.f32 1.0, %v655_v38 }
 0x145   :  { %v647_v54 = vadd.f32 1.0, %v646_v39  ;;  %v670_v19 = vadd.f32 1.0, %v1753_v47  ;;  %1077 = vlog2.f32 %v661_v43  ;;  %v1770_v35 = vadd.f32 %v556_v36, %v1654_v15 }
 0x146   :  { %v549_v22 = vsel %vm547_vm13, %v548_v46, %v546_v21  ;;  %1079 = vrcp.f32 %v433_v49  ;;  %v1775_v44 = vmul.f32 %v492_v32, %v1742_v42  ;;  %v1780_v39 = vadd.s32 4294967200, %v1562_v3 }
 0x147   :  { %v434_v63 = vmul.f32 %v418_v2, %v386_v16  ;;  %vm1782_vm14 = vcmp.lt.f32.partialorder %v658_v31, 0.0004427343  ;;  %vm1786_vm15 = vcmp.lt.f32.partialorder %v649_v37, 0.0004427343  ;;  %v1791_v49 = vmul.f32 %v1663_v26, %v443_v60 }
 0x148   :  { %v657_v36 = vmul.f32 %v656_v61, %v1702_v6  ;;  %v648_v21 = vmul.f32 %v647_v54, %v1708_v55  ;;  %1081 = vlog2.f32 %v670_v19  ;;  %v1796_v32 = vadd.f32 %v549_v22, %v1656_v18 }
 0x149   :  { %v1070_v57 = vpop.eup %1069  ;;  %v688_v46 = vadd.f32 1.0, %v1770_v35  ;;  %vm566_vm0 = vcmp.eq.f32.partialorder %v1722_v8, inf  ;;  %vm568_vm1 = vcmp.eq.f32.partialorder %v1722_v8, 0.0  ;;  %1083 = vrsqrt.f32 %v1775_v44 }
 0x14a   :  { %v1072_v52 = vpop.eup %1071  ;;  %v654_v16 = vmul.f32 0.6931472, %v1070_v57  ;;  %v673_v6 = vmul.f32 -0.5, %v1753_v47  ;;  %v664_v18 = vmul.f32 -0.5, %v1740_v23  ;;  %v569_v55 = vand.u32 2147483648, %v1722_v8 }
 0x14b   :  { %v1074_v58 = vpop.eup %1073  ;;  %v645_v31 = vmul.f32 0.6931472, %v1072_v52  ;;  %vm559_vm2 = vcmp.eq.f32.partialorder %v1732_v33, inf  ;;  %v679_v60 = vadd.f32 1.0, %v1796_v32  ;;  %v562_v19 = vand.u32 2147483648, %v1732_v33 }
 0x14c   :  { %v1076_v2 = vpop.eup %1075  ;;  %v565_v37 = vmul.f32 %v1074_v58, %v1722_v8  ;;  %v660_v57 = vsel %vm1782_vm14, %v657_v36, %v654_v16  ;;  %1085 = vlog2.f32 %v688_v46  ;;  %v214_v58 = vpop.xlane.xlu1 %213  ;;  %vm561_vm3 = vcmp.eq.f32.partialorder %v1732_v33, 0.0 }
 0x14d   :  { %v558_v26 = vmul.f32 %v1076_v2, %v1732_v33  ;;  %v651_v22 = vsel %vm1786_vm15, %v648_v21, %v645_v31  ;;  %v676_v2 = vand.u32 2147483647, %v1753_v47  ;;  %v667_v15 = vand.u32 2147483647, %v1740_v23 }
 0x14e   :  { %v567_v61 = vsel %vm566_vm0, %v1722_v8, %v565_v37  ;;  %v491_v8 = vadd.f32 2.0, %v1791_v49  ;;  %v691_v36 = vmul.f32 -0.5, %v1770_v35  ;;  %v789_v16 = vmul.f32 %v1590_v9, %v660_v57 }
 0x14f   :  { %v560_v54 = vsel %vm559_vm2, %v1732_v33, %v558_v26  ;;  %v570_v52 = vsel %vm568_vm1, %v569_v55, %v567_v61  ;;  %v1078_v37 = vpop.eup %1077  ;;  %v674_v26 = vadd.f32 1.0, %v673_v6  ;;  %v788_v31 = vmul.f32 %v1590_v9, %v651_v22  ;;  %v211_v6 = vpop.xlane.xlu0 %210 }
 0x150   :  { %v1818_v38 = vadd.f32 %v570_v52, %v1683_v14  ;;  %v563_v43 = vsel %vm561_vm3, %v562_v19, %v560_v54  ;;  %v1824_v21 = vpop.eup %1079  ;;  %v665_v46 = vadd.f32 1.0, %v664_v18  ;;  %1087 = vlog2.f32 %v679_v60 }
 0x151   :  { %1089 = vrcp.f32 %v434_v63  ;;  %v694_v14 = vand.u32 2147483647, %v1770_v35  ;;  %v446_v55 = vmul.f32 2.0, %v214_v58  ;;  %vm848_vm4 = vcmask 130112   ;;  %v220_v58 = vpop.xlane.xlu1 %219 }
 0x152   :  { %v706_v33 = vadd.f32 1.0, %v1818_v38  ;;  %v1082_v61 = vpop.eup %1081  ;;  %vm1830_vm5 = vcmp.lt.f32.partialorder %v676_v2, 0.0004427343  ;;  %v663_v54 = vmul.f32 0.6931472, %v1078_v37  ;;  %v1835_v19 = vadd.f32 %v563_v43, %v1692_v30 }
 0x153   :  { %v1838_v18 = vmul.f32 %v491_v8, %v1791_v49  ;;  %v675_v63 = vmul.f32 %v674_v26, %v1753_v47  ;;  %vm1841_vm6 = vcmp.lt.f32.partialorder %v667_v15, 0.0004427343  ;;  %v692_v57 = vadd.f32 1.0, %v691_v36  ;;  %v1084_v2 = vpop.eup %1083 }
 0x154   :  { %v682_v22 = vmul.f32 -0.5, %v1796_v32  ;;  %v806_v20 = vadd.f32 %v1592_v1, %v789_v16  ;;  %v805_v37 = vadd.f32 %v1592_v1, %v788_v31  ;;  %v666_v30 = vmul.f32 %v665_v46, %v1740_v23 }
 0x155   :  { %v685_v8 = vand.u32 2147483647, %v1796_v32  ;;  %v672_v43 = vmul.f32 0.6931472, %v1082_v61  ;;  %vm1850_vm7 = vcmp.lt.f32.partialorder %v694_v14, 0.0004427343  ;;  %1091 = vlog2.f32 %v706_v33  ;;  %v217_v33 = vpop.xlane.xlu0 %216 }
 0x156   :  { %v579_v26 = vmul.f32 %v1084_v2, %v1775_v44  ;;  %vm580_vm8 = vcmp.eq.f32.partialorder %v1775_v44, inf  ;;  %v669_v15 = vsel %vm1841_vm6, %v666_v30, %v663_v54  ;;  %v697_v36 = vadd.f32 1.0, %v1835_v19  ;;  %v1086_v23 = vpop.eup %1085 }
 0x157   :  { %v583_v16 = vand.u32 2147483648, %v1775_v44  ;;  %1093 = vrsqrt.f32 %v1838_v18  ;;  %v693_v31 = vmul.f32 %v692_v57, %v1770_v35  ;;  %v683_v46 = vadd.f32 1.0, %v682_v22 }
 0x158   :  { %v581_v14 = vsel %vm580_vm8, %v1775_v44, %v579_v26  ;;  %vm582_vm9 = vcmp.eq.f32.partialorder %v1775_v44, 0.0  ;;  %v847_v61 = vrot.slane %v806_v20, %v846_v24  ;;  %v842_v54 = vrot.slane %v805_v37, %v841_v17  ;;  %v226_v24 = vpop.xlane.xlu1 %225 }
 0x159   :  { %vm1870_vm10 = vcmp.lt.f32.partialorder %v685_v8, 0.0004427343  ;;  %v584_v2 = vsel %vm582_vm9, %v583_v16, %v581_v14  ;;  %v1875_v35 = vmul.f32 %v1724_v25, %v446_v55  ;;  %v678_v44 = vsel %vm1830_vm5, %v675_v63, %v672_v43 }
 0x15a   :  { %v790_v57 = vmul.f32 %v1590_v9, %v669_v15  ;;  %v445_v22 = vmul.f32 2.0, %v211_v6  ;;  %v448_v51 = vmul.f32 2.0, %v220_v58  ;;  %v1088_v20 = vpop.eup %1087  ;;  %v690_v30 = vmul.f32 0.6931472, %v1086_v23 }
 0x15b   :  { %1095 = vlog2.f32 %v697_v36  ;;  %v494_v17 = vadd.f32 2.0, %v1875_v35  ;;  %v447_v37 = vmul.f32 2.0, %v217_v33  ;;  %v1090_v8 = vpop.eup %1089  ;;  %v709_v26 = vmul.f32 -0.5, %v1818_v38 }
 0x15c   :  { %v700_v25 = vmul.f32 -0.5, %v1835_v19  ;;  %v1884_v55 = vadd.f32 %v584_v2, %v1742_v42  ;;  %v1887_v52 = vmul.f32 %v1716_v45, %v445_v22  ;;  %v1893_v63 = vmul.f32 %v1756_v41, %v448_v51 }
 0x15d   :  { %v1890_v6 = vmul.f32 %v494_v17, %v1875_v35  ;;  %v1896_v58 = vmul.f32 %v1748_v40, %v447_v37  ;;  %v450_v43 = vmul.f32 2.0, %v226_v24  ;;  %v1899_v15 = vsel %vm848_vm4, %v847_v61, %v842_v54  ;;  %v223_v24 = vpop.xlane.xlu0 %222 }
 0x15e   :  { %v791_v36 = vmul.f32 %v1590_v9, %v678_v44  ;;  %v681_v42 = vmul.f32 0.6931472, %v1088_v20  ;;  %v684_v16 = vmul.f32 %v683_v46, %v1796_v32  ;;  %v696_v45 = vsel %vm1850_vm7, %v693_v31, %v690_v30 }
 0x15f   :  { %v712_v23 = vand.u32 2147483647, %v1818_v38  ;;  %v703_v41 = vand.u32 2147483647, %v1835_v19  ;;  %1097 = vrsqrt.f32 %v1890_v6  ;;  %v1092_v40 = vpop.eup %1091  ;;  %v807_v14 = vadd.f32 %v1592_v1, %v790_v57 }
 0x160   :  { %v710_v33 = vadd.f32 1.0, %v709_v26  ;;  %v701_v61 = vadd.f32 1.0, %v700_v25  ;;  %v493_v54 = vadd.f32 2.0, %v1887_v52  ;;  %v724_v44 = vadd.f32 1.0, %v1884_v55 }
 0x161   :  { %v1094_v2 = vpop.eup %1093  ;;  %v496_v32 = vadd.f32 2.0, %v1893_v63  ;;  %v495_v47 = vadd.f32 2.0, %v1896_v58  ;;  %v1913_v31 = vmul.f32 %v1090_v8, %v450_v43  ;;  %vm855_vm11 = vcmask 195712  }
 0x162   :  { %v793_v46 = vmul.f32 %v1590_v9, %v696_v45  ;;  %v687_v22 = vsel %vm1870_vm10, %v684_v16, %v681_v42  ;;  %v572_v57 = vmul.f32 %v1094_v2, %v1838_v18  ;;  %v1920_v51 = vmul.f32 %v493_v54, %v1887_v52 }
 0x163   :  { %vm573_vm12 = vcmp.eq.f32.partialorder %v1838_v18, inf  ;;  %v576_v20 = vand.u32 2147483648, %v1838_v18  ;;  %v1925_v30 = vmul.f32 %v496_v32, %v1893_v63  ;;  %v1928_v17 = vmul.f32 %v495_v47, %v1896_v58 }
 0x164   :  { %v708_v37 = vmul.f32 0.6931472, %v1092_v40  ;;  %v574_v60 = vsel %vm573_vm12, %v1838_v18, %v572_v57  ;;  %vm575_vm13 = vcmp.eq.f32.partialorder %v1838_v18, 0.0  ;;  %1099 = vrsqrt.f32 %v1920_v51 }
 0x165   :  { %v1096_v8 = vpop.eup %1095  ;;  %1101 = vlog2.f32 %v724_v44  ;;  %v577_v26 = vsel %vm575_vm13, %v576_v20, %v574_v60  ;;  %v498_v25 = vadd.f32 2.0, %v1913_v31  ;;  %v449_v43 = vmul.f32 2.0, %v223_v24 }
 0x166   :  { %v808_v42 = vadd.f32 %v1592_v1, %v791_v36  ;;  %v792_v16 = vmul.f32 %v1590_v9, %v687_v22  ;;  %v1937_v45 = vadd.f32 %v577_v26, %v1791_v49  ;;  %1103 = vrsqrt.f32 %v1925_v30 }
 0x167   :  { %v854_v18 = vrot.slane %v807_v14, %v853_v13  ;;  %v711_v40 = vmul.f32 %v710_v33, %v1818_v38  ;;  %vm1944_vm14 = vcmp.lt.f32.partialorder %v712_v23, 0.0004427343  ;;  %1105 = vrsqrt.f32 %v1928_v17 }
 0x168   :  { %v699_v36 = vmul.f32 0.6931472, %v1096_v8  ;;  %v702_v2 = vmul.f32 %v701_v61, %v1835_v19  ;;  %vm1950_vm15 = vcmp.lt.f32.partialorder %v703_v41, 0.0004427343  ;;  %v715_v44 = vadd.f32 1.0, %v1937_v45 }
 0x169   :  { %v1098_v32 = vpop.eup %1097  ;;  %v810_v59 = vadd.f32 %v1592_v1, %v793_v46  ;;  %v714_v13 = vsel %vm1944_vm14, %v711_v40, %v708_v37  ;;  %v1959_v38 = vmul.f32 %v498_v25, %v1913_v31  ;;  %v1962_v23 = vmul.f32 %v1824_v21, %v449_v43 }
 0x16a   :  { %v809_v19 = vadd.f32 %v1592_v1, %v792_v16  ;;  %v727_v41 = vmul.f32 -0.5, %v1884_v55  ;;  %1107 = vlog2.f32 %v715_v44  ;;  %v593_v14 = vmul.f32 %v1098_v32, %v1890_v6 }
 0x16b   :  { %v730_v33 = vand.u32 2147483647, %v1884_v55  ;;  %vm594_vm0 = vcmp.eq.f32.partialorder %v1890_v6, inf  ;;  %v597_v61 = vand.u32 2147483648, %v1890_v6  ;;  %1109 = vrsqrt.f32 %v1959_v38 }
 0x16c   :  { %v795_v47 = vmul.f32 %v1590_v9, %v714_v13  ;;  %v705_v21 = vsel %vm1950_vm15, %v702_v2, %v699_v36  ;;  %v595_v46 = vsel %vm594_vm0, %v1890_v6, %v593_v14  ;;  %vm596_vm1 = vcmp.eq.f32.partialorder %v1890_v6, 0.0 }
 0x16d   :  { %v1979_v22 = vrot.slane %v808_v42, %v860_v62  ;;  %v1983_v57 = vsel %vm855_vm11, %v854_v18, %v1899_v15  ;;  %v598_v24 = vsel %vm596_vm1, %v597_v61, %v595_v46  ;;  %v497_v20 = vadd.f32 2.0, %v1962_v23 }
 0x16e   :  { %v1100_v37 = vpop.eup %1099  ;;  %v1989_v60 = vrot.slane %v810_v59, %v874_v11  ;;  %v1994_v6 = vrot.slane %v809_v19, %v867_v12  ;;  %v728_v53 = vadd.f32 1.0, %v727_v41  ;;  %v1997_v62 = vadd.f32 %v598_v24, %v1875_v35 }
 0x16f   :  { %v1102_v15 = vpop.eup %1101  ;;  %v794_v8 = vmul.f32 %v1590_v9, %v705_v21  ;;  %vm2000_vm2 = vcmp.lt.f32.partialorder %v730_v33, 0.0004427343  ;;  %v586_v48 = vmul.f32 %v1100_v37, %v1920_v51  ;;  %v2006_v11 = vmul.f32 %v497_v20, %v1962_v23 }
 0x170   :  { %v1104_v25 = vpop.eup %1103  ;;  %v812_v29 = vadd.f32 %v1592_v1, %v795_v47  ;;  %v742_v12 = vadd.f32 1.0, %v1997_v62  ;;  %vm587_vm3 = vcmp.eq.f32.partialorder %v1920_v51, inf  ;;  %v590_v35 = vand.u32 2147483648, %v1920_v51 }
 0x171   :  { %v1106_v43 = vpop.eup %1105  ;;  %v588_v42 = vsel %vm587_vm3, %v1920_v51, %v586_v48  ;;  %vm589_vm4 = vcmp.eq.f32.partialorder %v1920_v51, 0.0  ;;  %v607_v16 = vmul.f32 %v1104_v25, %v1925_v30  ;;  %1111 = vrsqrt.f32 %v2006_v11 }
 0x172   :  { %v718_v18 = vmul.f32 -0.5, %v1937_v45  ;;  %v591_v40 = vsel %vm589_vm4, %v590_v35, %v588_v42  ;;  %vm608_vm5 = vcmp.eq.f32.partialorder %v1925_v30, inf  ;;  %v611_v54 = vand.u32 2147483648, %v1925_v30 }
 0x173   :  { %v2020_v36 = vadd.f32 %v591_v40, %v1887_v52  ;;  %v609_v2 = vsel %vm608_vm5, %v1925_v30, %v607_v16  ;;  %vm610_vm6 = vcmp.eq.f32.partialorder %v1925_v30, 0.0  ;;  %v600_v51 = vmul.f32 %v1106_v43, %v1928_v17 }
 0x174   :  { %v1108_v49 = vpop.eup %1107  ;;  %v726_v44 = vmul.f32 0.6931472, %v1102_v15  ;;  %v729_v32 = vmul.f32 %v728_v53, %v1884_v55  ;;  %1113 = vlog2.f32 %v742_v12  ;;  %v612_v59 = vsel %vm610_vm6, %v611_v54, %v609_v2 }
 0x175   :  { %v1110_v13 = vpop.eup %1109  ;;  %v2029_v19 = vrot.slane %v812_v29, %v888_v27  ;;  %v811_v52 = vadd.f32 %v1592_v1, %v794_v8  ;;  %v733_v41 = vadd.f32 1.0, %v2020_v36  ;;  %vm601_vm7 = vcmp.eq.f32.partialorder %v1928_v17, inf }
 0x176   :  { %vm862_vm8 = vcmask 261312   ;;  %v719_v30 = vadd.f32 1.0, %v718_v18  ;;  %v2035_v14 = vadd.f32 %v612_v59, %v1893_v63  ;;  %v602_v55 = vsel %vm601_vm7, %v1928_v17, %v600_v51 }
 0x177   :  { %v621_v33 = vmul.f32 %v1110_v13, %v1959_v38  ;;  %vm869_vm9 = vcmask 326912   ;;  %v721_v0 = vand.u32 2147483647, %v1937_v45  ;;  %1115 = vlog2.f32 %v733_v41 }
 0x178   :  { %vm603_vm10 = vcmp.eq.f32.partialorder %v1928_v17, 0.0  ;;  %v604_v27 = vand.u32 2147483648, %v1928_v17  ;;  %v732_v61 = vsel %vm2000_vm2, %v729_v32, %v726_v44  ;;  %v717_v47 = vmul.f32 0.6931472, %v1108_v49 }
 0x179   :  { %v760_v21 = vadd.f32 1.0, %v2035_v14  ;;  %vm622_vm11 = vcmp.eq.f32.partialorder %v1959_v38, inf  ;;  %v745_v63 = vmul.f32 -0.5, %v1997_v62  ;;  %v625_v20 = vand.u32 2147483648, %v1959_v38 }
 0x17a   :  { %v605_v46 = vsel %vm603_vm10, %v604_v27, %v602_v55  ;;  %v623_v24 = vsel %vm622_vm11, %v1959_v38, %v621_v33  ;;  %vm876_vm12 = vcmask 392512   ;;  %v720_v37 = vmul.f32 %v719_v30, %v1937_v45 }
 0x17b   :  { %v736_v17 = vmul.f32 -0.5, %v2020_v36  ;;  %1117 = vlog2.f32 %v760_v21  ;;  %vm624_vm13 = vcmp.eq.f32.partialorder %v1959_v38, 0.0  ;;  %v1112_v53 = vpop.eup %1111  ;;  %v882_v15 = vrot.slane %v811_v52, %v881_v28 }
 0x17c   :  { %vm2055_vm14 = vcmp.lt.f32.partialorder %v721_v0, 0.0004427343  ;;  %v2060_v26 = vadd.f32 %v605_v46, %v1896_v58  ;;  %v626_v48 = vsel %vm624_vm13, %v625_v20, %v623_v24  ;;  %vm883_vm15 = vcmask 458112  }
 0x17d   :  { %v797_v45 = vmul.f32 %v1590_v9, %v732_v61  ;;  %v723_v25 = vsel %vm2055_vm14, %v720_v37, %v717_v47  ;;  %v2066_v38 = vadd.f32 %v626_v48, %v1913_v31  ;;  %v614_v10 = vmul.f32 %v1112_v53, %v2006_v11 }
 0x17e   :  { %v746_v28 = vadd.f32 1.0, %v745_v63  ;;  %v751_v29 = vadd.f32 1.0, %v2060_v26  ;;  %vm615_vm0 = vcmp.eq.f32.partialorder %v2006_v11, inf  ;;  %v618_v58 = vand.u32 2147483648, %v2006_v11  ;;  %v1114_v12 = vpop.eup %1113 }
 0x17f   :  { %v737_v35 = vadd.f32 1.0, %v736_v17  ;;  %v739_v43 = vand.u32 2147483647, %v2020_v36  ;;  %v778_v42 = vadd.f32 1.0, %v2066_v38  ;;  %v616_v16 = vsel %vm615_vm0, %v2006_v11, %v614_v10 }
 0x180   :  { %vm890_vm1 = vcmask 523712   ;;  %v796_v31 = vmul.f32 %v1590_v9, %v723_v25  ;;  %v763_v18 = vmul.f32 -0.5, %v2035_v14  ;;  %1119 = vlog2.f32 %v751_v29 }
 0x181   :  { %vm617_vm2 = vcmp.eq.f32.partialorder %v2006_v11, 0.0  ;;  %v748_v40 = vand.u32 2147483647, %v1997_v62  ;;  %1121 = vlog2.f32 %v778_v42  ;;  %v863_v2 = vsel %vm862_vm8, %v1979_v22, %v1983_v57  ;;  %v1116_v51 = vpop.eup %1115 }
 0x182   :  { %v619_v54 = vsel %vm617_vm2, %v618_v58, %v616_v16  ;;  %vm897_vm3 = vcmask 589312   ;;  %v744_v49 = vmul.f32 0.6931472, %v1114_v12  ;;  %v747_v44 = vmul.f32 %v746_v28, %v1997_v62 }
 0x183   :  { %v2084_v32 = vadd.f32 %v619_v54, %v1962_v23  ;;  %v870_v59 = vsel %vm869_vm9, %v1994_v6, %v863_v2  ;;  %v735_v11 = vmul.f32 0.6931472, %v1116_v51  ;;  %v738_v13 = vmul.f32 %v737_v35, %v2020_v36 }
 0x184   :  { %vm740_vm4 = vcmp.lt.f32.partialorder %v739_v43, 0.0004427343  ;;  %v754_v52 = vmul.f32 -0.5, %v2060_v26  ;;  %v813_v41 = vadd.f32 %v1592_v1, %v796_v31  ;;  %v764_v22 = vadd.f32 1.0, %v763_v18 }
 0x185   :  { %v781_v57 = vmul.f32 -0.5, %v2066_v38  ;;  %v769_v30 = vadd.f32 1.0, %v2084_v32  ;;  %v1118_v62 = vpop.eup %1117  ;;  %vm2093_vm5 = vcmp.lt.f32.partialorder %v748_v40, 0.0004427343  ;;  %v741_v55 = vsel %vm740_vm4, %v738_v13, %v735_v11 }
 0x186   :  { %v766_v6 = vand.u32 2147483647, %v2035_v14  ;;  %v877_v36 = vsel %vm876_vm12, %v1989_v60, %v870_v59  ;;  %vm904_vm6 = vcmask 654912   ;;  %v750_v33 = vsel %vm2093_vm5, %v747_v44, %v744_v49 }
 0x187   :  { %v798_v0 = vmul.f32 %v1590_v9, %v741_v55  ;;  %v762_v27 = vmul.f32 0.6931472, %v1118_v62  ;;  %1123 = vlog2.f32 %v769_v30  ;;  %v755_v61 = vadd.f32 1.0, %v754_v52 }
 0x188   :  { %v757_v47 = vand.u32 2147483647, %v2060_v26  ;;  %v814_v21 = vadd.f32 %v1592_v1, %v797_v45  ;;  %v884_v63 = vsel %vm883_vm15, %v882_v15, %v877_v36  ;;  %v765_v46 = vmul.f32 %v764_v22, %v2035_v14 }
 0x189   :  { %v782_v24 = vadd.f32 1.0, %v781_v57  ;;  %v784_v60 = vand.u32 2147483647, %v2066_v38  ;;  %v896_v20 = vrot.slane %v813_v41, %v895_v34  ;;  %vm2111_vm7 = vcmp.lt.f32.partialorder %v766_v6, 0.0004427343 }
 0x18a   :  { %v772_v17 = vmul.f32 -0.5, %v2084_v32  ;;  %v799_v53 = vmul.f32 %v1590_v9, %v750_v33  ;;  %v927_v8 = vadd.s32 4294967192, %v1562_v3  ;;  %v1120_v15 = vpop.eup %1119  ;;  %v768_v14 = vsel %vm2111_vm7, %v765_v46, %v762_v27 }
 0x18b   :  { %v815_v48 = vadd.f32 %v1592_v1, %v798_v0  ;;  %v891_v56 = vsel %vm890_vm1, %v2029_v19, %v884_v63  ;;  %v923_v34 = vsub.s32 %v1780_v39, %v1576_v50  ;;  %v1122_v45 = vpop.eup %1121  ;;  %v753_v25 = vmul.f32 0.6931472, %v1120_v15 }
 0x18c   :  { %v756_v10 = vmul.f32 %v755_v61, %v2060_v26  ;;  %vm758_vm8 = vcmp.lt.f32.partialorder %v757_v47, 0.0004427343  ;;  %v2197_v28 = vsub.s32 %v1646_v7, %v1576_v50  ;;  %v783_v58 = vmul.f32 %v782_v24, %v2066_v38 }
 0x18d   :  { %v780_v12 = vmul.f32 0.6931472, %v1122_v45  ;;  %vm785_vm9 = vcmp.lt.f32.partialorder %v784_v60, 0.0004427343  ;;  %v898_v35 = vsel %vm897_vm3, %v896_v20, %v891_v56  ;;  %v773_v43 = vadd.f32 1.0, %v772_v17 }
 0x18e   :  { %v903_v29 = vrot.slane %v814_v21, %v2197_v28  ;;  %v759_v19 = vsel %vm758_vm8, %v756_v10, %v753_v25  ;;  %v801_v42 = vmul.f32 %v1590_v9, %v768_v14  ;;  %v816_v39 = vadd.f32 %v1592_v1, %v799_v53 }
 0x18f   :  { %v775_v16 = vand.u32 2147483647, %v2084_v32  ;;  %v786_v26 = vsel %vm785_vm9, %v783_v58, %v780_v12  ;;  %v800_v31 = vmul.f32 %v1590_v9, %v759_v19  ;;  %v2198_v7 = vsub.s32 %v1705_v4, %v1576_v50 }
 0x190   :  { %v803_v38 = vmul.f32 %v1590_v9, %v786_v26  ;;  %vm911_vm10 = vcmask 720512   ;;  %v941_v40 = vadd.s32 4294967176, %v1562_v3  ;;  %v905_v51 = vsel %vm904_vm6, %v903_v29, %v898_v35 }
 0x191   :  { %v910_v18 = vrot.slane %v815_v48, %v2198_v7  ;;  %v1124_v54 = vpop.eup %1123  ;;  %v817_v2 = vadd.f32 %v1592_v1, %v800_v31  ;;  %v930_v49 = vsub.s32 %v927_v8, %v1576_v50  ;;  %v934_v44 = vadd.s32 4294967184, %v1562_v3 }
 0x192   :  { %v774_v59 = vmul.f32 %v773_v43, %v2084_v32  ;;  %v771_v11 = vmul.f32 0.6931472, %v1124_v54  ;;  %v818_v4 = vadd.f32 %v1592_v1, %v801_v42  ;;  %v2199_v13 = vsub.s32 %v1712_v5, %v1576_v50 }
 0x193   :  { %vm776_vm11 = vcmp.lt.f32.partialorder %v775_v16, 0.0004427343  ;;  %v912_v41 = vsel %vm911_vm10, %v910_v18, %v905_v51  ;;  %vm918_vm12 = vcmask 786112   ;;  %v924_v22 = vrot.slane %v817_v2, %v923_v34 }
 0x194   :  { %v917_v52 = vrot.slane %v816_v39, %v2199_v13  ;;  %v777_v57 = vsel %vm776_vm11, %v774_v59, %v771_v11  ;;  %v820_v30 = vadd.f32 %v1592_v1, %v803_v38  ;;  %vm925_vm13 = vcmask 851712  }
 0x195   :  { %v944_v62 = vsub.s32 %v941_v40, %v1576_v50  ;;  %v802_v3 = vmul.f32 %v1590_v9, %v777_v57  ;;  %v937_v32 = vsub.s32 %v934_v44, %v1576_v50  ;;  %v931_v55 = vrot.slane %v818_v4, %v930_v49 }
 0x196   :  { %v919_v23 = vsel %vm918_vm12, %v917_v52, %v912_v41  ;;  %vm932_vm14 = vcmask 917312   ;;  %vm939_vm15 = vcmask 982912   ;;  %vm946_vm0 = vcmask 1048512  }
 0x197   :  { %v819_v6 = vadd.f32 %v1592_v1, %v802_v3  ;;  %v926_v5 = vsel %vm925_vm13, %v924_v22, %v919_v23  ;;  %v945_v36 = vrot.slane %v820_v30, %v944_v62 }
 0x198   :  { %v933_v0 = vsel %vm932_vm14, %v931_v55, %v926_v5 }
 0x199   :  { %v938_v33 = vrot.slane %v819_v6, %v937_v32 }
 0x19b   :  { %v940_v27 = vsel %vm939_vm15, %v938_v33, %v933_v0 }
 0x19c   :  { %v947_v61 = vsel %vm946_vm0, %v945_v36, %v940_v27 }
 0x19d   :  { %949 = vst [vmem:[#allocation14] sm:$0x1] %v947_v61 }
 0x19e   :  { %1200 = shalt.err (!%p1197_p13)
}
 0x19f   :  { %s1201_s18 = scalar_lea.hbm %s2170_s6, 16 }
 0x1a0   :  { %p1202_p0 = scmp.ne.s32.totalorder %s2170_s6, %s1201_s18  ;;  %p1205_p1 = scmp.lt.u32.totalorder %s1201_s18, %s2170_s6 }
 0x1a2   :  { %p1207_p2 = pnand %p1205_p1, %p1202_p0 }
 0x1a4   :  { %1210 = shalt.err (!%p1207_p2)
}
 0x1a5   :  { %959 = dma.vmem_to_hbm [thread:$0]  %s957_s15, 16, %s2170_s6, [#allocation11]  }
 0x1a6   :  { %1221 = dma.done.wait [#allocation11], 16  }
 0x1a7   :  { %1222 = vsyncadd [#allocation11], 4294967280 }
 0x1a8   :  { %963 = vsyncpa [#allocation10], 1 }
 0x1a9   :  { %964 = vsyncpa [#allocation13], 1 }
 0x1aa   :  { %965 = vsyncpa [#allocation11], 1 }

</bundles_post_ra>
